<compile_context>
chip_gen: v6e
topology: v6e:2x2x1
jax: 0.10.0
libtpu: 0.0.40
codegen_flags: <defaults>
</compile_context>

<pallas_src>
import jax
import jax.numpy as jnp
from jax import lax
from jax.experimental import pallas as pl
from jax.experimental.pallas import tpu as pltpu

BN_EPS = 1e-5


def _down_kernel(x_ref, w1_ref, b1_ref, w2_ref, b2_ref, o_ref,
                 pad1_ref, pad2_ref, patch1_ref, patch2_ref):
    # x_ref     : (H, W, Cin)        one batch element, NHWC
    # w1_ref    : (9*Cin, C1)        conv1 weights (BN scale folded), k=(dy*3+dx)*Cin+ci
    # b1_ref    : (1, C1)            conv1 folded BN bias
    # w2_ref    : (C2, 9*C1)         conv2 weights (BN scale folded), k=(dy*3+dx)*C1+ci
    # b2_ref    : (C2, 1)            conv2 folded BN bias
    # o_ref     : (C2, Hp*Wp)        output, NCHW-flat layout
    # pad*_ref  : VMEM zero-padded activations (halo built in VMEM, no HBM pad)
    # patch*_ref: VMEM im2col patch matrices
    H, W, Cin = x_ref.shape
    Hp, Wp = H // 2, W // 2
    C1 = w1_ref.shape[1]
    C2 = w2_ref.shape[0]

    # ---- 1. MaxPool2d(2): 4 strided reads (leading + sublane dims) ----------
    pooled = x_ref[pl.ds(0, Hp, stride=2), pl.ds(0, Wp, stride=2), :]
    for dy in range(2):
        for dx in range(2):
            if dy == 0 and dx == 0:
                continue
            pooled = jnp.maximum(
                pooled,
                x_ref[pl.ds(dy, Hp, stride=2), pl.ds(dx, Wp, stride=2), :])

    # ---- 2. zero-pad pooled input into VMEM scratch (padding=1) -------------
    pad1_ref[...] = jnp.zeros_like(pad1_ref)
    pad1_ref[1:Hp + 1, 1:Wp + 1, :] = pooled

    # ---- 3. conv1: single im2col matmul (K = 9*Cin) + BN bias + ReLU --------
    for dy in range(3):
        for dx in range(3):
            t = dy * 3 + dx
            win = pad1_ref[dy:dy + Hp, dx:dx + Wp, :]            # (Hp, Wp, Cin)
            patch1_ref[:, t * Cin:(t + 1) * Cin] = win.reshape(Hp * Wp, Cin)
    y1 = jnp.dot(patch1_ref[...], w1_ref[...],
                 preferred_element_type=jnp.float32)             # (Hp*Wp, C1)
    y1 = jnp.maximum(y1 + b1_ref[...], 0.0)                      # BN(eval)+ReLU

    # ---- 4. zero-pad conv1 activation in VMEM --------------------------------
    pad2_ref[...] = jnp.zeros_like(pad2_ref)
    pad2_ref[1:Hp + 1, 1:Wp + 1, :] = y1.reshape(Hp, Wp, C1)

    # ---- 5. conv2: single im2col matmul, result directly (C2, Hp*Wp) = NCHW --
    for dy in range(3):
        for dx in range(3):
            t = dy * 3 + dx
            win = pad2_ref[dy:dy + Hp, dx:dx + Wp, :]            # (Hp, Wp, C1)
            patch2_ref[:, t * C1:(t + 1) * C1] = win.reshape(Hp * Wp, C1)
    # (C2, K2) x (Hp*Wp, K2)^T -> (C2, Hp*Wp): lane-dense NCHW-flat output.
    y2 = lax.dot_general(w2_ref[...], patch2_ref[...],
                         dimension_numbers=(((1,), (1,)), ((), ())),
                         preferred_element_type=jnp.float32)
    y2 = jnp.maximum(y2 + b2_ref[...], 0.0)                      # BN(eval)+ReLU
    o_ref[...] = y2.astype(o_ref.dtype)


def _fold_conv_bn(w, gamma, beta, mean, var):
    # w: (Cout, Cin, 3, 3)  (PyTorch OIHW layout)
    scale = gamma / jnp.sqrt(var + BN_EPS)                       # (Cout,)
    bias = beta - mean * scale                                   # (Cout,)
    w_folded = w * scale[:, None, None, None]                    # fold BN scale
    return w_folded.astype(jnp.float32), bias.astype(jnp.float32)


def down_forward(x_nchw, params):
    """Down = MaxPool2d(2) -> (Conv3x3(no bias) -> BN -> ReLU) x 2. NCHW in/out."""
    N, Cin, H, W = x_nchw.shape
    Hp, Wp = H // 2, W // 2

    w1f, b1 = _fold_conv_bn(params["w1"], params["gamma1"], params["beta1"],
                            params["mean1"], params["var1"])
    w2f, b2 = _fold_conv_bn(params["w2"], params["gamma2"], params["beta2"],
                            params["mean2"], params["var2"])
    C1, C2 = w1f.shape[0], w2f.shape[0]

    # Matmul-ready weights; contraction index k = (dy*3+dx)*Cin + ci.
    w1mat = jnp.transpose(w1f, (2, 3, 1, 0)).reshape(9 * Cin, C1)   # (9*Cin, C1)
    w2mat = jnp.transpose(w2f, (0, 2, 3, 1)).reshape(C2, 9 * C1)    # (C2, 9*C1)
    b1 = b1.reshape(1, C1)
    b2 = b2.reshape(C2, 1)

    x_nhwc = jnp.transpose(x_nchw, (0, 2, 3, 1)).astype(jnp.float32)

    out = pl.pallas_call(
        _down_kernel,
        out_shape=jax.ShapeDtypeStruct((N, C2, Hp * Wp), jnp.float32),
        grid=(N,),
        in_specs=[
            pl.BlockSpec((None, H, W, Cin), lambda n: (n, 0, 0, 0)),
            pl.BlockSpec((9 * Cin, C1), lambda n: (0, 0)),
            pl.BlockSpec((1, C1), lambda n: (0, 0)),
            pl.BlockSpec((C2, 9 * C1), lambda n: (0, 0)),
            pl.BlockSpec((C2, 1), lambda n: (0, 0)),
        ],
        out_specs=pl.BlockSpec((None, C2, Hp * Wp), lambda n: (n, 0, 0)),
        scratch_shapes=[
            pltpu.VMEM((Hp + 2, Wp + 2, Cin), jnp.float32),   # padded pooled x
            pltpu.VMEM((Hp + 2, Wp + 2, C1), jnp.float32),    # padded conv1 act
            pltpu.VMEM((Hp * Wp, 9 * Cin), jnp.float32),      # im2col patches 1
            pltpu.VMEM((Hp * Wp, 9 * C1), jnp.float32),       # im2col patches 2
        ],
        compiler_params=pltpu.CompilerParams(
            dimension_semantics=("parallel",)),
    )(x_nhwc, w1mat, b1, w2mat, b2)

    # (N, C2, Hp*Wp) is already NCHW-contiguous: this reshape is free.
    return out.reshape(N, C2, Hp, Wp)


# ----------------------------- pure-JAX reference -----------------------------
def ref_down(x_nchw, params):
    x = lax.reduce_window(x_nchw, -jnp.inf, lax.max,
                          (1, 1, 2, 2), (1, 1, 2, 2), "VALID")

    def conv_bn_relu(x, w, gamma, beta, mean, var):
        y = lax.conv_general_dilated(x, w, (1, 1), "SAME",
                                     dimension_numbers=("NCHW", "OIHW", "NCHW"))
        scale = gamma / jnp.sqrt(var + BN_EPS)
        bias = beta - mean * scale
        y = y * scale[None, :, None, None] + bias[None, :, None, None]
        return jnp.maximum(y, 0.0)

    x = conv_bn_relu(x, params["w1"], params["gamma1"], params["beta1"],
                     params["mean1"], params["var1"])
    x = conv_bn_relu(x, params["w2"], params["gamma2"], params["beta2"],
                     params["mean2"], params["var2"])
    return x


if __name__ == "__main__":
    key = jax.random.PRNGKey(0)
    N, Cin, H, W = 2, 4, 16, 16
    Cout = 8          # Down(4, 8): mid_channels == out_channels == 8
    ks = jax.random.split(key, 11)
    x = jax.random.normal(ks[0], (N, Cin, H, W), jnp.float32)
    params = {
        "w1": 0.2 * jax.random.normal(ks[1], (Cout, Cin, 3, 3), jnp.float32),
        "gamma1": 1.0 + 0.1 * jax.random.normal(ks[2], (Cout,), jnp.float32),
        "beta1": 0.1 * jax.random.normal(ks[3], (Cout,), jnp.float32),
        "mean1": 0.1 * jax.random.normal(ks[4], (Cout,), jnp.float32),
        "var1": 1.0 + 0.1 * jax.random.uniform(ks[5], (Cout,), jnp.float32),
        "w2": 0.2 * jax.random.normal(ks[6], (Cout, Cout, 3, 3), jnp.float32),
        "gamma2": 1.0 + 0.1 * jax.random.normal(ks[7], (Cout,), jnp.float32),
        "beta2": 0.1 * jax.random.normal(ks[8], (Cout,), jnp.float32),
        "mean2": 0.1 * jax.random.normal(ks[9], (Cout,), jnp.float32),
        "var2": 1.0 + 0.1 * jax.random.uniform(ks[10], (Cout,), jnp.float32),
    }

    down_fn = jax.jit(down_forward)
    out = jax.block_until_ready(down_fn(x, params))
    ref = jax.block_until_ready(ref_down(x, params))

    assert out.shape == (N, Cout, H // 2, W // 2), out.shape
    max_err = float(jnp.max(jnp.abs(out - ref)))
    assert jnp.allclose(out, ref, rtol=1e-2, atol=1e-3), max_err
    print("KERNEL_OK")
</pallas_src>

<mosaic_0001>
module attributes {stable_mosaic.version = 11 : i64} {
  func.func @_down_kernel(%arg0: i32, %arg1: memref<1x16x16x4xf32, #tpu.memory_space<vmem>>, %arg2: memref<36x8xf32, #tpu.memory_space<vmem>>, %arg3: memref<1x8xf32, #tpu.memory_space<vmem>>, %arg4: memref<8x72xf32, #tpu.memory_space<vmem>>, %arg5: memref<8x1xf32, #tpu.memory_space<vmem>>, %arg6: memref<1x8x64xf32, #tpu.memory_space<vmem>>, %arg7: memref<10x10x4xf32, #tpu.memory_space<vmem>>, %arg8: memref<10x10x8xf32, #tpu.memory_space<vmem>>, %arg9: memref<64x36xf32, #tpu.memory_space<vmem>>, %arg10: memref<64x72xf32, #tpu.memory_space<vmem>>) attributes {dimension_semantics = [#tpu.dimension_semantics<parallel>], iteration_bounds = array<i64: 2>, scalar_prefetch = 0 : i64, scratch_operands = 4 : i64, tpu.core_type = #tpu.core_type<tc>, window_params = [{transform_indices = @transform_0, window_bounds = array<i64: 1, 16, 16, 4>}, {pipeline_mode = #tpu.pipeline_mode<synchronous>, transform_indices = @transform_1, window_bounds = array<i64: 36, 8>}, {pipeline_mode = #tpu.pipeline_mode<synchronous>, transform_indices = @transform_2, window_bounds = array<i64: 1, 8>}, {pipeline_mode = #tpu.pipeline_mode<synchronous>, transform_indices = @transform_3, window_bounds = array<i64: 8, 72>}, {pipeline_mode = #tpu.pipeline_mode<synchronous>, transform_indices = @transform_4, window_bounds = array<i64: 8, 1>}, {transform_indices = @transform_5, window_bounds = array<i64: 1, 8, 64>}]} {
    %c0 = arith.constant 0 : index
    %c0_0 = arith.constant 0 : index
    %c0_1 = arith.constant 0 : index
    %c0_2 = arith.constant 0 : index
    %0 = tpu.strided_load %arg1[%c0, %c0_0, %c0_1, %c0_2] {strides = array<i32: 1, 2, 2, 1>} : memref<1x16x16x4xf32, #tpu.memory_space<vmem>>, vector<1x8x8x4xf32>
    %1 = vector.shape_cast %0 : vector<1x8x8x4xf32> to vector<8x8x4xf32>
    %c0_3 = arith.constant 0 : index
    %c0_4 = arith.constant 0 : index
    %c1 = arith.constant 1 : index
    %c0_5 = arith.constant 0 : index
    %2 = tpu.strided_load %arg1[%c0_3, %c0_4, %c1, %c0_5] {strides = array<i32: 1, 2, 2, 1>} : memref<1x16x16x4xf32, #tpu.memory_space<vmem>>, vector<1x8x8x4xf32>
    %3 = vector.shape_cast %2 : vector<1x8x8x4xf32> to vector<8x8x4xf32>
    %4 = arith.maximumf %1, %3 : vector<8x8x4xf32>
    %c0_6 = arith.constant 0 : index
    %c1_7 = arith.constant 1 : index
    %c0_8 = arith.constant 0 : index
    %c0_9 = arith.constant 0 : index
    %5 = tpu.strided_load %arg1[%c0_6, %c1_7, %c0_8, %c0_9] {strides = array<i32: 1, 2, 2, 1>} : memref<1x16x16x4xf32, #tpu.memory_space<vmem>>, vector<1x8x8x4xf32>
    %6 = vector.shape_cast %5 : vector<1x8x8x4xf32> to vector<8x8x4xf32>
    %7 = arith.maximumf %4, %6 : vector<8x8x4xf32>
    %c0_10 = arith.constant 0 : index
    %c1_11 = arith.constant 1 : index
    %c1_12 = arith.constant 1 : index
    %c0_13 = arith.constant 0 : index
    %8 = tpu.strided_load %arg1[%c0_10, %c1_11, %c1_12, %c0_13] {strides = array<i32: 1, 2, 2, 1>} : memref<1x16x16x4xf32, #tpu.memory_space<vmem>>, vector<1x8x8x4xf32>
    %9 = vector.shape_cast %8 : vector<1x8x8x4xf32> to vector<8x8x4xf32>
    %10 = arith.maximumf %7, %9 : vector<8x8x4xf32>
    %cst = arith.constant 0.000000e+00 : f32
    %11 = vector.broadcast %cst : f32 to vector<10x10x4xf32>
    %c0_14 = arith.constant 0 : index
    %c0_15 = arith.constant 0 : index
    %c0_16 = arith.constant 0 : index
    %12 = vector.load %arg7[%c0_14, %c0_15, %c0_16] : memref<10x10x4xf32, #tpu.memory_space<vmem>>, vector<10x10x4xf32>
    tpu.vector_store %arg7[%c0_14, %c0_15, %c0_16], %11 {strides = array<i32>} : memref<10x10x4xf32, #tpu.memory_space<vmem>>, vector<10x10x4xf32>,
    %c1_17 = arith.constant 1 : index
    %c1_18 = arith.constant 1 : index
    %c0_19 = arith.constant 0 : index
    %13 = vector.load %arg7[%c1_17, %c1_18, %c0_19] : memref<10x10x4xf32, #tpu.memory_space<vmem>>, vector<8x8x4xf32>
    tpu.vector_store %arg7[%c1_17, %c1_18, %c0_19], %10 {strides = array<i32>} : memref<10x10x4xf32, #tpu.memory_space<vmem>>, vector<8x8x4xf32>,
    %c0_20 = arith.constant 0 : index
    %c0_21 = arith.constant 0 : index
    %c0_22 = arith.constant 0 : index
    %14 = vector.load %arg7[%c0_20, %c0_21, %c0_22] : memref<10x10x4xf32, #tpu.memory_space<vmem>>, vector<8x8x4xf32>
    %15 = vector.shape_cast %14 : vector<8x8x4xf32> to vector<64x4xf32>
    %c0_23 = arith.constant 0 : index
    %c0_24 = arith.constant 0 : index
    %16 = vector.load %arg9[%c0_23, %c0_24] : memref<64x36xf32, #tpu.memory_space<vmem>>, vector<64x4xf32>
    tpu.vector_store %arg9[%c0_23, %c0_24], %15 {strides = array<i32>} : memref<64x36xf32, #tpu.memory_space<vmem>>, vector<64x4xf32>,
    %c0_25 = arith.constant 0 : index
    %c1_26 = arith.constant 1 : index
    %c0_27 = arith.constant 0 : index
    %17 = vector.load %arg7[%c0_25, %c1_26, %c0_27] : memref<10x10x4xf32, #tpu.memory_space<vmem>>, vector<8x8x4xf32>
    %18 = vector.shape_cast %17 : vector<8x8x4xf32> to vector<64x4xf32>
    %c0_28 = arith.constant 0 : index
    %c4 = arith.constant 4 : index
    %19 = vector.load %arg9[%c0_28, %c4] : memref<64x36xf32, #tpu.memory_space<vmem>>, vector<64x4xf32>
    tpu.vector_store %arg9[%c0_28, %c4], %18 {strides = array<i32>} : memref<64x36xf32, #tpu.memory_space<vmem>>, vector<64x4xf32>,
    %c0_29 = arith.constant 0 : index
    %c2 = arith.constant 2 : index
    %c0_30 = arith.constant 0 : index
    %20 = vector.load %arg7[%c0_29, %c2, %c0_30] : memref<10x10x4xf32, #tpu.memory_space<vmem>>, vector<8x8x4xf32>
    %21 = vector.shape_cast %20 : vector<8x8x4xf32> to vector<64x4xf32>
    %c0_31 = arith.constant 0 : index
    %c8 = arith.constant 8 : index
    %22 = vector.load %arg9[%c0_31, %c8] : memref<64x36xf32, #tpu.memory_space<vmem>>, vector<64x4xf32>
    tpu.vector_store %arg9[%c0_31, %c8], %21 {strides = array<i32>} : memref<64x36xf32, #tpu.memory_space<vmem>>, vector<64x4xf32>,
    %c1_32 = arith.constant 1 : index
    %c0_33 = arith.constant 0 : index
    %c0_34 = arith.constant 0 : index
    %23 = vector.load %arg7[%c1_32, %c0_33, %c0_34] : memref<10x10x4xf32, #tpu.memory_space<vmem>>, vector<8x8x4xf32>
    %24 = vector.shape_cast %23 : vector<8x8x4xf32> to vector<64x4xf32>
    %c0_35 = arith.constant 0 : index
    %c12 = arith.constant 12 : index
    %25 = vector.load %arg9[%c0_35, %c12] : memref<64x36xf32, #tpu.memory_space<vmem>>, vector<64x4xf32>
    tpu.vector_store %arg9[%c0_35, %c12], %24 {strides = array<i32>} : memref<64x36xf32, #tpu.memory_space<vmem>>, vector<64x4xf32>,
    %c1_36 = arith.constant 1 : index
    %c1_37 = arith.constant 1 : index
    %c0_38 = arith.constant 0 : index
    %26 = vector.load %arg7[%c1_36, %c1_37, %c0_38] : memref<10x10x4xf32, #tpu.memory_space<vmem>>, vector<8x8x4xf32>
    %27 = vector.shape_cast %26 : vector<8x8x4xf32> to vector<64x4xf32>
    %c0_39 = arith.constant 0 : index
    %c16 = arith.constant 16 : index
    %28 = vector.load %arg9[%c0_39, %c16] : memref<64x36xf32, #tpu.memory_space<vmem>>, vector<64x4xf32>
    tpu.vector_store %arg9[%c0_39, %c16], %27 {strides = array<i32>} : memref<64x36xf32, #tpu.memory_space<vmem>>, vector<64x4xf32>,
    %c1_40 = arith.constant 1 : index
    %c2_41 = arith.constant 2 : index
    %c0_42 = arith.constant 0 : index
    %29 = vector.load %arg7[%c1_40, %c2_41, %c0_42] : memref<10x10x4xf32, #tpu.memory_space<vmem>>, vector<8x8x4xf32>
    %30 = vector.shape_cast %29 : vector<8x8x4xf32> to vector<64x4xf32>
    %c0_43 = arith.constant 0 : index
    %c20 = arith.constant 20 : index
    %31 = vector.load %arg9[%c0_43, %c20] : memref<64x36xf32, #tpu.memory_space<vmem>>, vector<64x4xf32>
    tpu.vector_store %arg9[%c0_43, %c20], %30 {strides = array<i32>} : memref<64x36xf32, #tpu.memory_space<vmem>>, vector<64x4xf32>,
    %c2_44 = arith.constant 2 : index
    %c0_45 = arith.constant 0 : index
    %c0_46 = arith.constant 0 : index
    %32 = vector.load %arg7[%c2_44, %c0_45, %c0_46] : memref<10x10x4xf32, #tpu.memory_space<vmem>>, vector<8x8x4xf32>
    %33 = vector.shape_cast %32 : vector<8x8x4xf32> to vector<64x4xf32>
    %c0_47 = arith.constant 0 : index
    %c24 = arith.constant 24 : index
    %34 = vector.load %arg9[%c0_47, %c24] : memref<64x36xf32, #tpu.memory_space<vmem>>, vector<64x4xf32>
    tpu.vector_store %arg9[%c0_47, %c24], %33 {strides = array<i32>} : memref<64x36xf32, #tpu.memory_space<vmem>>, vector<64x4xf32>,
    %c2_48 = arith.constant 2 : index
    %c1_49 = arith.constant 1 : index
    %c0_50 = arith.constant 0 : index
    %35 = vector.load %arg7[%c2_48, %c1_49, %c0_50] : memref<10x10x4xf32, #tpu.memory_space<vmem>>, vector<8x8x4xf32>
    %36 = vector.shape_cast %35 : vector<8x8x4xf32> to vector<64x4xf32>
    %c0_51 = arith.constant 0 : index
    %c28 = arith.constant 28 : index
    %37 = vector.load %arg9[%c0_51, %c28] : memref<64x36xf32, #tpu.memory_space<vmem>>, vector<64x4xf32>
    tpu.vector_store %arg9[%c0_51, %c28], %36 {strides = array<i32>} : memref<64x36xf32, #tpu.memory_space<vmem>>, vector<64x4xf32>,
    %c2_52 = arith.constant 2 : index
    %c2_53 = arith.constant 2 : index
    %c0_54 = arith.constant 0 : index
    %38 = vector.load %arg7[%c2_52, %c2_53, %c0_54] : memref<10x10x4xf32, #tpu.memory_space<vmem>>, vector<8x8x4xf32>
    %39 = vector.shape_cast %38 : vector<8x8x4xf32> to vector<64x4xf32>
    %c0_55 = arith.constant 0 : index
    %c32 = arith.constant 32 : index
    %40 = vector.load %arg9[%c0_55, %c32] : memref<64x36xf32, #tpu.memory_space<vmem>>, vector<64x4xf32>
    tpu.vector_store %arg9[%c0_55, %c32], %39 {strides = array<i32>} : memref<64x36xf32, #tpu.memory_space<vmem>>, vector<64x4xf32>,
    %c0_56 = arith.constant 0 : index
    %c0_57 = arith.constant 0 : index
    %41 = vector.load %arg9[%c0_56, %c0_57] : memref<64x36xf32, #tpu.memory_space<vmem>>, vector<64x36xf32>
    %c0_58 = arith.constant 0 : index
    %c0_59 = arith.constant 0 : index
    %42 = vector.load %arg2[%c0_58, %c0_59] : memref<36x8xf32, #tpu.memory_space<vmem>>, vector<36x8xf32>
    %cst_60 = arith.constant dense<0.000000e+00> : vector<64x8xf32>
    %43 = tpu.matmul %41, %42, %cst_60 {dimension_numbers = #tpu.dot_dimension_numbers<[1], [0], [0], [1], [0, 0, 1, 1], [], []>} : vector<64x36xf32>, vector<36x8xf32>, vector<64x8xf32> -> vector<64x8xf32>
    %c0_61 = arith.constant 0 : index
    %c0_62 = arith.constant 0 : index
    %44 = vector.load %arg3[%c0_61, %c0_62] : memref<1x8xf32, #tpu.memory_space<vmem>>, vector<1x8xf32>
    %45 = vector.broadcast %44 : vector<1x8xf32> to vector<64x8xf32>
    %46 = arith.addf %43, %45 : vector<64x8xf32>
    %cst_63 = arith.constant 0.000000e+00 : f32
    %47 = vector.broadcast %cst_63 : f32 to vector<64x8xf32>
    %48 = arith.maximumf %46, %47 : vector<64x8xf32>
    %cst_64 = arith.constant 0.000000e+00 : f32
    %49 = vector.broadcast %cst_64 : f32 to vector<10x10x8xf32>
    %c0_65 = arith.constant 0 : index
    %c0_66 = arith.constant 0 : index
    %c0_67 = arith.constant 0 : index
    %50 = vector.load %arg8[%c0_65, %c0_66, %c0_67] : memref<10x10x8xf32, #tpu.memory_space<vmem>>, vector<10x10x8xf32>
    tpu.vector_store %arg8[%c0_65, %c0_66, %c0_67], %49 {strides = array<i32>} : memref<10x10x8xf32, #tpu.memory_space<vmem>>, vector<10x10x8xf32>,
    %51 = vector.shape_cast %48 : vector<64x8xf32> to vector<8x8x8xf32>
    %c1_68 = arith.constant 1 : index
    %c1_69 = arith.constant 1 : index
    %c0_70 = arith.constant 0 : index
    %52 = vector.load %arg8[%c1_68, %c1_69, %c0_70] : memref<10x10x8xf32, #tpu.memory_space<vmem>>, vector<8x8x8xf32>
    tpu.vector_store %arg8[%c1_68, %c1_69, %c0_70], %51 {strides = array<i32>} : memref<10x10x8xf32, #tpu.memory_space<vmem>>, vector<8x8x8xf32>,
    %c0_71 = arith.constant 0 : index
    %c0_72 = arith.constant 0 : index
    %c0_73 = arith.constant 0 : index
    %53 = vector.load %arg8[%c0_71, %c0_72, %c0_73] : memref<10x10x8xf32, #tpu.memory_space<vmem>>, vector<8x8x8xf32>
    %54 = vector.shape_cast %53 : vector<8x8x8xf32> to vector<64x8xf32>
    %c0_74 = arith.constant 0 : index
    %c0_75 = arith.constant 0 : index
    %55 = vector.load %arg10[%c0_74, %c0_75] : memref<64x72xf32, #tpu.memory_space<vmem>>, vector<64x8xf32>
    tpu.vector_store %arg10[%c0_74, %c0_75], %54 {strides = array<i32>} : memref<64x72xf32, #tpu.memory_space<vmem>>, vector<64x8xf32>,
    %c0_76 = arith.constant 0 : index
    %c1_77 = arith.constant 1 : index
    %c0_78 = arith.constant 0 : index
    %56 = vector.load %arg8[%c0_76, %c1_77, %c0_78] : memref<10x10x8xf32, #tpu.memory_space<vmem>>, vector<8x8x8xf32>
    %57 = vector.shape_cast %56 : vector<8x8x8xf32> to vector<64x8xf32>
    %c0_79 = arith.constant 0 : index
    %c8_80 = arith.constant 8 : index
    %58 = vector.load %arg10[%c0_79, %c8_80] : memref<64x72xf32, #tpu.memory_space<vmem>>, vector<64x8xf32>
    tpu.vector_store %arg10[%c0_79, %c8_80], %57 {strides = array<i32>} : memref<64x72xf32, #tpu.memory_space<vmem>>, vector<64x8xf32>,
    %c0_81 = arith.constant 0 : index
    %c2_82 = arith.constant 2 : index
    %c0_83 = arith.constant 0 : index
    %59 = vector.load %arg8[%c0_81, %c2_82, %c0_83] : memref<10x10x8xf32, #tpu.memory_space<vmem>>, vector<8x8x8xf32>
    %60 = vector.shape_cast %59 : vector<8x8x8xf32> to vector<64x8xf32>
    %c0_84 = arith.constant 0 : index
    %c16_85 = arith.constant 16 : index
    %61 = vector.load %arg10[%c0_84, %c16_85] : memref<64x72xf32, #tpu.memory_space<vmem>>, vector<64x8xf32>
    tpu.vector_store %arg10[%c0_84, %c16_85], %60 {strides = array<i32>} : memref<64x72xf32, #tpu.memory_space<vmem>>, vector<64x8xf32>,
    %c1_86 = arith.constant 1 : index
    %c0_87 = arith.constant 0 : index
    %c0_88 = arith.constant 0 : index
    %62 = vector.load %arg8[%c1_86, %c0_87, %c0_88] : memref<10x10x8xf32, #tpu.memory_space<vmem>>, vector<8x8x8xf32>
    %63 = vector.shape_cast %62 : vector<8x8x8xf32> to vector<64x8xf32>
    %c0_89 = arith.constant 0 : index
    %c24_90 = arith.constant 24 : index
    %64 = vector.load %arg10[%c0_89, %c24_90] : memref<64x72xf32, #tpu.memory_space<vmem>>, vector<64x8xf32>
    tpu.vector_store %arg10[%c0_89, %c24_90], %63 {strides = array<i32>} : memref<64x72xf32, #tpu.memory_space<vmem>>, vector<64x8xf32>,
    %c1_91 = arith.constant 1 : index
    %c1_92 = arith.constant 1 : index
    %c0_93 = arith.constant 0 : index
    %65 = vector.load %arg8[%c1_91, %c1_92, %c0_93] : memref<10x10x8xf32, #tpu.memory_space<vmem>>, vector<8x8x8xf32>
    %66 = vector.shape_cast %65 : vector<8x8x8xf32> to vector<64x8xf32>
    %c0_94 = arith.constant 0 : index
    %c32_95 = arith.constant 32 : index
    %67 = vector.load %arg10[%c0_94, %c32_95] : memref<64x72xf32, #tpu.memory_space<vmem>>, vector<64x8xf32>
    tpu.vector_store %arg10[%c0_94, %c32_95], %66 {strides = array<i32>} : memref<64x72xf32, #tpu.memory_space<vmem>>, vector<64x8xf32>,
    %c1_96 = arith.constant 1 : index
    %c2_97 = arith.constant 2 : index
    %c0_98 = arith.constant 0 : index
    %68 = vector.load %arg8[%c1_96, %c2_97, %c0_98] : memref<10x10x8xf32, #tpu.memory_space<vmem>>, vector<8x8x8xf32>
    %69 = vector.shape_cast %68 : vector<8x8x8xf32> to vector<64x8xf32>
    %c0_99 = arith.constant 0 : index
    %c40 = arith.constant 40 : index
    %70 = vector.load %arg10[%c0_99, %c40] : memref<64x72xf32, #tpu.memory_space<vmem>>, vector<64x8xf32>
    tpu.vector_store %arg10[%c0_99, %c40], %69 {strides = array<i32>} : memref<64x72xf32, #tpu.memory_space<vmem>>, vector<64x8xf32>,
    %c2_100 = arith.constant 2 : index
    %c0_101 = arith.constant 0 : index
    %c0_102 = arith.constant 0 : index
    %71 = vector.load %arg8[%c2_100, %c0_101, %c0_102] : memref<10x10x8xf32, #tpu.memory_space<vmem>>, vector<8x8x8xf32>
    %72 = vector.shape_cast %71 : vector<8x8x8xf32> to vector<64x8xf32>
    %c0_103 = arith.constant 0 : index
    %c48 = arith.constant 48 : index
    %73 = vector.load %arg10[%c0_103, %c48] : memref<64x72xf32, #tpu.memory_space<vmem>>, vector<64x8xf32>
    tpu.vector_store %arg10[%c0_103, %c48], %72 {strides = array<i32>} : memref<64x72xf32, #tpu.memory_space<vmem>>, vector<64x8xf32>,
    %c2_104 = arith.constant 2 : index
    %c1_105 = arith.constant 1 : index
    %c0_106 = arith.constant 0 : index
    %74 = vector.load %arg8[%c2_104, %c1_105, %c0_106] : memref<10x10x8xf32, #tpu.memory_space<vmem>>, vector<8x8x8xf32>
    %75 = vector.shape_cast %74 : vector<8x8x8xf32> to vector<64x8xf32>
    %c0_107 = arith.constant 0 : index
    %c56 = arith.constant 56 : index
    %76 = vector.load %arg10[%c0_107, %c56] : memref<64x72xf32, #tpu.memory_space<vmem>>, vector<64x8xf32>
    tpu.vector_store %arg10[%c0_107, %c56], %75 {strides = array<i32>} : memref<64x72xf32, #tpu.memory_space<vmem>>, vector<64x8xf32>,
    %c2_108 = arith.constant 2 : index
    %c2_109 = arith.constant 2 : index
    %c0_110 = arith.constant 0 : index
    %77 = vector.load %arg8[%c2_108, %c2_109, %c0_110] : memref<10x10x8xf32, #tpu.memory_space<vmem>>, vector<8x8x8xf32>
    %78 = vector.shape_cast %77 : vector<8x8x8xf32> to vector<64x8xf32>
    %c0_111 = arith.constant 0 : index
    %c64 = arith.constant 64 : index
    %79 = vector.load %arg10[%c0_111, %c64] : memref<64x72xf32, #tpu.memory_space<vmem>>, vector<64x8xf32>
    tpu.vector_store %arg10[%c0_111, %c64], %78 {strides = array<i32>} : memref<64x72xf32, #tpu.memory_space<vmem>>, vector<64x8xf32>,
    %c0_112 = arith.constant 0 : index
    %c0_113 = arith.constant 0 : index
    %80 = vector.load %arg4[%c0_112, %c0_113] : memref<8x72xf32, #tpu.memory_space<vmem>>, vector<8x72xf32>
    %c0_114 = arith.constant 0 : index
    %c0_115 = arith.constant 0 : index
    %81 = vector.load %arg10[%c0_114, %c0_115] : memref<64x72xf32, #tpu.memory_space<vmem>>, vector<64x72xf32>
    %cst_116 = arith.constant dense<0.000000e+00> : vector<8x64xf32>
    %82 = tpu.matmul %80, %81, %cst_116 {dimension_numbers = #tpu.dot_dimension_numbers<[1], [1], [0], [0], [0, 0, 1, 0], [], []>} : vector<8x72xf32>, vector<64x72xf32>, vector<8x64xf32> -> vector<8x64xf32>
    %c0_117 = arith.constant 0 : index
    %c0_118 = arith.constant 0 : index
    %83 = vector.load %arg5[%c0_117, %c0_118] : memref<8x1xf32, #tpu.memory_space<vmem>>, vector<8x1xf32>
    %84 = vector.broadcast %83 : vector<8x1xf32> to vector<8x64xf32>
    %85 = arith.addf %82, %84 : vector<8x64xf32>
    %cst_119 = arith.constant 0.000000e+00 : f32
    %86 = vector.broadcast %cst_119 : f32 to vector<8x64xf32>
    %87 = arith.maximumf %85, %86 : vector<8x64xf32>
    %c0_120 = arith.constant 0 : index
    %c0_121 = arith.constant 0 : index
    %c0_122 = arith.constant 0 : index
    %88 = vector.load %arg6[%c0_120, %c0_121, %c0_122] : memref<1x8x64xf32, #tpu.memory_space<vmem>>, vector<1x8x64xf32>
    %89 = vector.shape_cast %88 : vector<1x8x64xf32> to vector<8x64xf32>
    %90 = vector.shape_cast %87 : vector<8x64xf32> to vector<1x8x64xf32>
    tpu.vector_store %arg6[%c0_120, %c0_121, %c0_122], %90 {strides = array<i32>} : memref<1x8x64xf32, #tpu.memory_space<vmem>>, vector<1x8x64xf32>,
    return
  }
  func.func @transform_0(%arg0: i32) -> (i32, i32, i32, i32) {
    %c0_i32 = arith.constant 0 : i32
    %c0_i32_0 = arith.constant 0 : i32
    %c0_i32_1 = arith.constant 0 : i32
    %c0_i32_2 = arith.constant 0 : i32
    return %arg0, %c0_i32, %c0_i32_0, %c0_i32_1 : i32, i32, i32, i32
  }
  func.func @transform_1(%arg0: i32) -> (i32, i32) {
    %c0_i32 = arith.constant 0 : i32
    %c0_i32_0 = arith.constant 0 : i32
    %c0_i32_1 = arith.constant 0 : i32
    return %c0_i32, %c0_i32_0 : i32, i32
  }
  func.func @transform_2(%arg0: i32) -> (i32, i32) {
    %c0_i32 = arith.constant 0 : i32
    %c0_i32_0 = arith.constant 0 : i32
    %c0_i32_1 = arith.constant 0 : i32
    return %c0_i32, %c0_i32_0 : i32, i32
  }
  func.func @transform_3(%arg0: i32) -> (i32, i32) {
    %c0_i32 = arith.constant 0 : i32
    %c0_i32_0 = arith.constant 0 : i32
    %c0_i32_1 = arith.constant 0 : i32
    return %c0_i32, %c0_i32_0 : i32, i32
  }
  func.func @transform_4(%arg0: i32) -> (i32, i32) {
    %c0_i32 = arith.constant 0 : i32
    %c0_i32_0 = arith.constant 0 : i32
    %c0_i32_1 = arith.constant 0 : i32
    return %c0_i32, %c0_i32_0 : i32, i32
  }
  func.func @transform_5(%arg0: i32) -> (i32, i32, i32) {
    %c0_i32 = arith.constant 0 : i32
    %c0_i32_0 = arith.constant 0 : i32
    %c0_i32_1 = arith.constant 0 : i32
    return %arg0, %c0_i32, %c0_i32_0 : i32, i32, i32
  }
}

</mosaic_0001>

<bundles_post_ra>
// kernel: down_forward.1
= control target key start
LH: loop header
LB: loop body
LE: loop exit
PB: predicated region body
PF: predicated region fallthrough
CT: control target
= control target key end

     0   :  { %s1737_s18 = smov 0   ;;  %s2290_s0 = inlined_call_operand.vmem [shape: f32[2,16,16,4], index: 0, kind: input, shape index: {}]   ;;  %s2291_s1 = inlined_call_operand.vmem [shape: f32[36,8], index: 1, kind: input, shape index: {}]   ;;  %s2292_s2 = inlined_call_operand.vmem [shape: f32[1,8], index: 2, kind: input, shape index: {}]   ;;  %s2293_s3 = inlined_call_operand.vmem [shape: f32[8,72], index: 3, kind: input, shape index: {}]   ;;  %s2294_s4 = inlined_call_operand.vmem [shape: f32[8,1], index: 4, kind: input, shape index: {}]   ;;  %s2295_s5 = inlined_call_operand.vmem [shape: f32[2,8,64], index: 5, kind: output, shape index: {}]  }
   0x1 LB: > { %s1536_s19 = sadd.s32 4294967295, %s1690_s18   ;;  %p1540_p0 = scmp.ge.s32.totalorder %s1690_s18, 1  ;;  %s1690_s18 = sphi %s1737_s18, %s15_s18  }
   0x2   : > { %p187_p1 = scmp.lt.s32.totalorder %s1690_s18, 3 }
   0x4   : > { %p188_p2 = pnand %p1540_p0, %p187_p1 }
   0x5   : > { %p214_p3 = scmp.lt.s32.totalorder (!%p188_p2), %s1536_s19, 1  ;;  %s1693_s24 = smov (!%p188_p2), 8  }
   0x6   : > { %191 = sbr.rel (%p188_p2) target bundleno = 889 (0x379), region = 40  ;;  %s1694_s25 = smov (!%p188_p2), 4  }
   0x7   : > { %s1695_s26 = smov (!%p188_p2), 12   ;;  %s1696_s27 = smov (!%p188_p2), 16  }
   0x8   : > { %s1697_s28 = smov (!%p188_p2), 20   ;;  %s1698_s29 = smov (!%p188_p2), 24  }
   0x9   : > { %s1699_s7 = smov (!%p188_p2), 28   ;;  %s1700_s14 = smov (!%p188_p2), 32  }
   0xa   : > { %s1701_s17 = smov (!%p188_p2), 48   ;;  %s1703_s21 = smov (!%p188_p2), 64  }
   0xb   : > { %vm310_vm0 = vcmask 31744   ;;  %vm312_vm1 = vcmask 25600   ;;  %v1692_v0 = vmov 0.0   ;;  %s2297_s19 = smov (!%p214_p3, %s1536_s19), 1  ;;  %vm795_vm2 = vcmask 1043456  }
   0xc   : > { %311 = vst.msk [vmem:[#allocation2] sm:$0xff] %vm310_vm0, %v1692_v0  ;;  %314 = vst.msk [vmem:[#allocation2 + $0x10] sm:$0xff] %vm310_vm0, %v1692_v0  ;;  %1641 = vmatprep.subr.mxu1 %v1692_v0  ;;  %s1596_s20 = sshll.u32 %s2297_s19, 8  ;;  %vm397_vm3 = vcmask 64544   ;;  %vm446_vm4 = vcmask 97344   ;;  %vm495_vm5 = vcmask 130144  }
   0xd   : > { %313 = vst.msk [vmem:[#allocation2 + $0x8] sm:$0x3] %vm312_vm1, %v1692_v0  ;;  %315 = vst.msk [vmem:[#allocation2 + $0x18] sm:$0x3] %vm312_vm1, %v1692_v0  ;;  %s1796_s23 = scalar_lea.vmem %s2290_s0, %s1596_s20  ;;  %vm544_vm6 = vcmask 162944   ;;  %vm593_vm7 = vcmask 195744  }
   0xe   : > { %316 = vst.msk [vmem:[#allocation2 + $0x20] sm:$0xff] %vm310_vm0, %v1692_v0  ;;  %318 = vst.msk [vmem:[#allocation2 + $0x30] sm:$0xff] %vm310_vm0, %v1692_v0  ;;  %v223_v1 = vld [vmem:[%s1796_s23] ss:$2 sm:$0xff]  ;;  %v1551_v2 = vld [vmem:[%s1796_s23 + $0x1] ss:$2 sm:$0xff] }
   0xf   : > { %317 = vst.msk [vmem:[#allocation2 + $0x28] sm:$0x3] %vm312_vm1, %v1692_v0  ;;  %319 = vst.msk [vmem:[#allocation2 + $0x38] sm:$0x3] %vm312_vm1, %v1692_v0  ;;  %v1559_v3 = vld [vmem:[%s1796_s23 + $0x10] ss:$2 sm:$0xff]  ;;  %v254_v6 = vmax.f32 %v223_v1, %v1551_v2 }
  0x10   : > { %320 = vst.msk [vmem:[#allocation2 + $0x40] sm:$0xff] %vm310_vm0, %v1692_v0  ;;  %322 = vst.msk [vmem:[#allocation2 + $0x50] sm:$0xff] %vm310_vm0, %v1692_v0  ;;  %v1567_v7 = vld [vmem:[%s1796_s23 + $0x11] ss:$2 sm:$0xff]  ;;  %v1544_v8 = vld [vmem:[%s1796_s23 + $0x20] ss:$2 sm:$0xff] }
  0x11   : > { %321 = vst.msk [vmem:[#allocation2 + $0x48] sm:$0x3] %vm312_vm1, %v1692_v0  ;;  %323 = vst.msk [vmem:[#allocation2 + $0x58] sm:$0x3] %vm312_vm1, %v1692_v0  ;;  %v1552_v9 = vld [vmem:[%s1796_s23 + $0x21] ss:$2 sm:$0xff]  ;;  %v278_v11 = vmax.f32 %v254_v6, %v1559_v3 }
  0x12   : > { %324 = vst.msk [vmem:[#allocation2 + $0x60] sm:$0xff] %vm310_vm0, %v1692_v0  ;;  %326 = vst.msk [vmem:[#allocation2 + $0x70] sm:$0xff] %vm310_vm0, %v1692_v0  ;;  %v255_v12 = vmax.f32 %v1544_v8, %v1552_v9  ;;  %v1560_v13 = vld [vmem:[%s1796_s23 + $0x30] ss:$2 sm:$0xff]  ;;  %v1545_v14 = vld [vmem:[%s1796_s23 + $0x40] ss:$2 sm:$0xff] }
  0x13   : > { %325 = vst.msk [vmem:[#allocation2 + $0x68] sm:$0x3] %vm312_vm1, %v1692_v0  ;;  %327 = vst.msk [vmem:[#allocation2 + $0x78] sm:$0x3] %vm312_vm1, %v1692_v0  ;;  %v341_v10 = vld [vmem:[#allocation2] sm:$0xff]  ;;  %v302_v18 = vmax.f32 %v278_v11, %v1567_v7  ;;  %v761_v11 = vld [vmem:[%s2291_s1 + $0x18] sm:$0xff] }
  0x14   : > { %328 = vst.msk [vmem:[#allocation2 + $0x80] sm:$0xff] %vm310_vm0, %v1692_v0  ;;  %330 = vst.msk [vmem:[#allocation2 + $0x90] sm:$0xff] %vm310_vm0, %v1692_v0  ;;  %v406_v4 = vld [vmem:[#allocation2 + $0x2] sm:$0xff]  ;;  %v1568_v15 = vld [vmem:[%s1796_s23 + $0x31] ss:$2 sm:$0xff]  ;;  %v279_v19 = vmax.f32 %v255_v12, %v1560_v13  ;;  %vm643_vm8 = vcmask 228544  }
  0x15   : > { %329 = vst.msk [vmem:[#allocation2 + $0x88] sm:$0x3] %vm312_vm1, %v1692_v0  ;;  %331 = vst.msk [vmem:[#allocation2 + $0x98] sm:$0x3] %vm312_vm1, %v1692_v0  ;;  %v357_v5 = vld [vmem:[#allocation2 + $0x1] sm:$0xff]  ;;  %422 = vrot.lane.b32.xlu1 %v406_v4, %s1693_s24  ;;  %v760_v12 = vld [vmem:[%s2291_s1 + $0x10] sm:$0xff] }
  0x16   : > { %373 = vrot.lane.b32.xlu0 %v357_v5, %s1694_s25  ;;  %349 = vst.msk [vmem:[#allocation4] sm:$0xff] %vm310_vm0, %v341_v10  ;;  %v1553_v16 = vld [vmem:[%s1796_s23 + $0x41] ss:$2 sm:$0xff]  ;;  %v1561_v17 = vld [vmem:[%s1796_s23 + $0x50] ss:$2 sm:$0xff]  ;;  %333 = vst.msk [vmem:[#allocation2 + $0x11] sm:$0xff] %vm310_vm0, %v302_v18  ;;  %v303_v28 = vmax.f32 %v279_v19, %v1568_v15 }
  0x17   : > { %v256_v20 = vmax.f32 %v1545_v14, %v1553_v16  ;;  %v1546_v21 = vld [vmem:[%s1796_s23 + $0x60] ss:$2 sm:$0xff]  ;;  %v1554_v22 = vld [vmem:[%s1796_s23 + $0x61] ss:$2 sm:$0xff]  ;;  %v1562_v23 = vld [vmem:[%s1796_s23 + $0x70] ss:$2 sm:$0xff] }
  0x18   : > { %v1569_v24 = vld [vmem:[%s1796_s23 + $0x51] ss:$2 sm:$0xff]  ;;  %v257_v25 = vmax.f32 %v1546_v21, %v1554_v22  ;;  %v1547_v26 = vld [vmem:[%s1796_s23 + $0x80] ss:$2 sm:$0xff]  ;;  %v1555_v27 = vld [vmem:[%s1796_s23 + $0x81] ss:$2 sm:$0xff] }
  0x19   : > { %v280_v29 = vmax.f32 %v256_v20, %v1561_v17  ;;  %v1570_v30 = vld [vmem:[%s1796_s23 + $0x71] ss:$2 sm:$0xff]  ;;  %v258_v31 = vmax.f32 %v1547_v26, %v1555_v27  ;;  %v1563_v32 = vld [vmem:[%s1796_s23 + $0x90] ss:$2 sm:$0xff]  ;;  %v1548_v33 = vld [vmem:[%s1796_s23 + $0xa0] ss:$2 sm:$0xff] }
  0x1a   : > { %v281_v34 = vmax.f32 %v257_v25, %v1562_v23  ;;  %v1571_v35 = vld [vmem:[%s1796_s23 + $0x91] ss:$2 sm:$0xff]  ;;  %v1556_v36 = vld [vmem:[%s1796_s23 + $0xa1] ss:$2 sm:$0xff]  ;;  %v1564_v37 = vld [vmem:[%s1796_s23 + $0xb0] ss:$2 sm:$0xff] }
  0x1b   : > { %334 = vst.msk [vmem:[#allocation2 + $0x21] sm:$0xff] %vm310_vm0, %v303_v28  ;;  %v304_v38 = vmax.f32 %v280_v29, %v1569_v24  ;;  %v282_v39 = vmax.f32 %v258_v31, %v1563_v32  ;;  %v259_v40 = vmax.f32 %v1548_v33, %v1556_v36  ;;  %v1549_v41 = vld [vmem:[%s1796_s23 + $0xc0] ss:$2 sm:$0xff]  ;;  %v1557_v42 = vld [vmem:[%s1796_s23 + $0xc1] ss:$2 sm:$0xff]  ;;  %v610_v28 = vld [vmem:[#allocation2 + $0x90] sm:$0xff] }
  0x1c   : > { %v1565_v43 = vld [vmem:[%s1796_s23 + $0xd0] ss:$2 sm:$0xff]  ;;  %v305_v44 = vmax.f32 %v281_v34, %v1570_v30  ;;  %v1572_v45 = vld [vmem:[%s1796_s23 + $0xb1] ss:$2 sm:$0xff]  ;;  %v260_v46 = vmax.f32 %v1549_v41, %v1557_v42  ;;  %v1550_v47 = vld [vmem:[%s1796_s23 + $0xe0] ss:$2 sm:$0xff] }
  0x1d   : > { %v1558_v48 = vld [vmem:[%s1796_s23 + $0xe1] ss:$2 sm:$0xff]  ;;  %335 = vst.msk [vmem:[#allocation2 + $0x31] sm:$0xff] %vm310_vm0, %v304_v38  ;;  %v306_v49 = vmax.f32 %v282_v39, %v1571_v35  ;;  %v283_v50 = vmax.f32 %v259_v40, %v1564_v37  ;;  %v1573_v51 = vld [vmem:[%s1796_s23 + $0xd1] ss:$2 sm:$0xff]  ;;  %vm692_vm9 = vcmask 261344  }
  0x1e   : > { %v261_v52 = vmax.f32 %v1550_v47, %v1558_v48  ;;  %v1566_v53 = vld [vmem:[%s1796_s23 + $0xf0] ss:$2 sm:$0xff]  ;;  %336 = vst.msk [vmem:[#allocation2 + $0x41] sm:$0xff] %vm310_vm0, %v305_v44  ;;  %v284_v54 = vmax.f32 %v260_v46, %v1565_v43  ;;  %v1574_v55 = vld [vmem:[%s1796_s23 + $0xf1] ss:$2 sm:$0xff]  ;;  %v759_v13 = vld [vmem:[%s2291_s1 + $0x8] sm:$0xff] }
  0x1f   : > { %337 = vst.msk [vmem:[#allocation2 + $0x51] sm:$0xff] %vm310_vm0, %v306_v49  ;;  %v307_v56 = vmax.f32 %v283_v50, %v1572_v45  ;;  %v407_v58 = vld [vmem:[#allocation2 + $0x12] sm:$0xff]  ;;  %v762_v10 = vld [vmem:[%s2291_s1 + $0x20] sm:$0xf]  ;;  %vm741_vm10 = vcmask 294144   ;;  %vm770_vm11 = vcmask 293888  }
  0x20   : > { %v285_v57 = vmax.f32 %v261_v52, %v1566_v53  ;;  %v358_v59 = vld [vmem:[#allocation2 + $0x11] sm:$0xff]  ;;  %v308_v61 = vmax.f32 %v284_v54, %v1573_v51  ;;  %424 = vrot.lane.b32.xlu1 %v407_v58, %s1693_s24  ;;  %1619 = vmatprep.subr.msk.mxu0 %vm795_vm2, %v762_v10  ;;  %v758_v14 = vld [vmem:[%s2291_s1] sm:$0xff]  ;;  %vm912_vm12 = vcmask 64512   ;;  %vm914_vm13 = vcmask 58368   ;;  %s1702_s20 = smov 56  }
  0x21   : > { %v455_v60 = vld [vmem:[#allocation2 + $0x10] sm:$0xff]  ;;  %375 = vrot.lane.b32.xlu0 %v358_v59, %s1694_s25  ;;  %338 = vst.msk [vmem:[#allocation2 + $0x61] sm:$0xff] %vm310_vm0, %v307_v56  ;;  %1620 = vmatpush3.msk.msra.mxu0 %vm795_vm2, %v762_v10  ;;  %vm999_vm14 = vcmask 130112   ;;  %vm1048_vm15 = vcmask 195712   ;;  %vm1705_vm1 = vmmov 0   ;;  %vm1146_vm2 = vcmask 326912  }
  0x22   : > { %v309_v62 = vmax.f32 %v285_v57, %v1574_v55  ;;  %350 = vst.msk [vmem:[#allocation4 + $0x8] sm:$0xff] %vm310_vm0, %v455_v60  ;;  %v456_v63 = vld [vmem:[#allocation2 + $0x20] sm:$0xff]  ;;  %339 = vst.msk [vmem:[#allocation2 + $0x71] sm:$0xff] %vm310_vm0, %v308_v61  ;;  %1621 = vmatprep.subr.mxu0 %v761_v11  ;;  %v659_v29 = vld [vmem:[#allocation2 + $0x91] sm:$0xff]  ;;  %1657 = vmatprep.mubr.msk.f32.mxu1 %vm1705_vm1, %v1692_v0 }
  0x23   : > { %351 = vst.msk [vmem:[#allocation4 + $0x10] sm:$0xff] %vm310_vm0, %v456_v63  ;;  %v359_v3 = vld [vmem:[#allocation2 + $0x21] sm:$0xff]  ;;  %1622 = vmatpush3.msra.mxu0 %v761_v11  ;;  %v708_v32 = vld [vmem:[#allocation2 + $0x92] sm:$0xff] }
  0x24   : > { %340 = vst.msk [vmem:[#allocation2 + $0x81] sm:$0xff] %vm310_vm0, %v309_v62  ;;  %v457_v1 = vld [vmem:[#allocation2 + $0x30] sm:$0xff]  ;;  %473 = vrot.lane.b32.xlu1 %v456_v63, %s1695_s26  ;;  %v408_v7 = vld [vmem:[#allocation2 + $0x22] sm:$0xff]  ;;  %1623 = vmatprep.subr.mxu0 %v760_v12 }
  0x25   : > { %471 = vrot.lane.b32.xlu0 %v455_v60, %s1695_s26  ;;  %v458_v2 = vld [vmem:[#allocation2 + $0x40] sm:$0xff]  ;;  %352 = vst.msk [vmem:[#allocation4 + $0x18] sm:$0xff] %vm310_vm0, %v457_v1  ;;  %v360_v8 = vld [vmem:[#allocation2 + $0x31] sm:$0xff]  ;;  %1624 = vmatpush3.msra.mxu0 %v760_v12 }
  0x26   : > { %v459_v4 = vld [vmem:[#allocation2 + $0x50] sm:$0xff]  ;;  %353 = vst.msk [vmem:[#allocation4 + $0x20] sm:$0xff] %vm310_vm0, %v458_v2  ;;  %v507_v15 = vld [vmem:[#allocation2 + $0x41] sm:$0xff]  ;;  %1625 = vmatprep.subr.mxu0 %v759_v13 }
  0x27   : > { %354 = vst.msk [vmem:[#allocation4 + $0x28] sm:$0xff] %vm310_vm0, %v459_v4  ;;  %v409_v9 = vld [vmem:[#allocation2 + $0x32] sm:$0xff]  ;;  %1626 = vmatpush3.msra.mxu0 %v759_v13  ;;  %v410_v16 = vld [vmem:[#allocation2 + $0x42] sm:$0xff] }
  0x28   : > { %v1850_v5 = vld [vmem:[#allocation2 + $0x60] sm:$0xff]  ;;  %377 = vrot.lane.b32.xlu1 %v359_v3, %s1694_s25  ;;  %1627 = vmatprep.subr.mxu0 %v758_v14  ;;  %v362_v17 = vld [vmem:[#allocation2 + $0x51] sm:$0xff]  ;;  %918 = vst.msk [vmem:[#allocation3 + $0x20] sm:$0xff] %vm912_vm12, %v1692_v0  ;;  %913 = vst.msk [vmem:[#allocation3] sm:$0xff] %vm912_vm12, %v1692_v0 }
  0x29   : > { %520 = vrot.lane.b32.xlu0 %v358_v59, %s1696_s27  ;;  %v1854_v6 = vld [vmem:[#allocation2 + $0x70] sm:$0xff]  ;;  %355 = vst.msk [vmem:[#allocation4 + $0x30] sm:$0xff] %vm310_vm0, %v1850_v5  ;;  %1628 = vmatpush3.msra.mxu0 %v758_v14  ;;  %v509_v19 = vld [vmem:[#allocation2 + $0x61] sm:$0xff] }
  0x2a   : > { %356 = vst.msk [vmem:[#allocation4 + $0x38] sm:$0xff] %vm310_vm0, %v1854_v6  ;;  %v411_v18 = vld [vmem:[#allocation2 + $0x52] sm:$0xff]  ;;  %v558_v21 = vld [vmem:[#allocation2 + $0x62] sm:$0xff]  ;;  %vm1097_vm0 = vcmask 261312  }
  0x2b   : > { %v364_v20 = vld [vmem:[#allocation2 + $0x71] sm:$0xff]  ;;  %v462_v23 = vld [vmem:[#allocation2 + $0x80] sm:$0xff]  ;;  %919 = vst.msk [vmem:[#allocation3 + $0x28] sm:$0x3] %vm914_vm13, %v1692_v0  ;;  %915 = vst.msk [vmem:[#allocation3 + $0x8] sm:$0x3] %vm914_vm13, %v1692_v0 }
  0x2c   : > { %569 = vrot.lane.b32.xlu1 %v407_v58, %s1697_s28  ;;  %v413_v22 = vld [vmem:[#allocation2 + $0x72] sm:$0xff]  ;;  %v511_v24 = vld [vmem:[#allocation2 + $0x81] sm:$0xff]  ;;  %916 = vst.msk [vmem:[#allocation3 + $0x10] sm:$0xff] %vm912_vm12, %v1692_v0  ;;  %920 = vst.msk [vmem:[#allocation3 + $0x30] sm:$0xff] %vm912_vm12, %v1692_v0 }
  0x2d   : > { %522 = vrot.lane.b32.xlu0 %v359_v3, %s1696_s27  ;;  %v560_v27 = vld [vmem:[#allocation2 + $0x82] sm:$0xff]  ;;  %917 = vst.msk [vmem:[#allocation3 + $0x18] sm:$0x3] %vm914_vm13, %v1692_v0  ;;  %921 = vst.msk [vmem:[#allocation3 + $0x38] sm:$0x3] %vm914_vm13, %v1692_v0 }
  0x2e   : > { %922 = vst.msk [vmem:[#allocation3 + $0x40] sm:$0xff] %vm912_vm12, %v1692_v0  ;;  %924 = vst.msk [vmem:[#allocation3 + $0x50] sm:$0xff] %vm912_vm12, %v1692_v0 }
  0x2f   : > { %923 = vst.msk [vmem:[#allocation3 + $0x48] sm:$0x3] %vm914_vm13, %v1692_v0  ;;  %925 = vst.msk [vmem:[#allocation3 + $0x58] sm:$0x3] %vm914_vm13, %v1692_v0 }
  0x30   : > { %426 = vrot.lane.b32.xlu1 %v408_v7, %s1693_s24  ;;  %926 = vst.msk [vmem:[#allocation3 + $0x60] sm:$0xff] %vm912_vm12, %v1692_v0  ;;  %928 = vst.msk [vmem:[#allocation3 + $0x70] sm:$0xff] %vm912_vm12, %v1692_v0 }
  0x31   : > { %379 = vrot.lane.b32.xlu0 %v360_v8, %s1694_s25  ;;  %927 = vst.msk [vmem:[#allocation3 + $0x68] sm:$0x3] %vm914_vm13, %v1692_v0  ;;  %929 = vst.msk [vmem:[#allocation3 + $0x78] sm:$0x3] %vm914_vm13, %v1692_v0 }
  0x32   : > { %930 = vst.msk [vmem:[#allocation3 + $0x80] sm:$0xff] %vm912_vm12, %v1692_v0  ;;  %932 = vst.msk [vmem:[#allocation3 + $0x90] sm:$0xff] %vm912_vm12, %v1692_v0 }
  0x33   : > { %931 = vst.msk [vmem:[#allocation3 + $0x88] sm:$0x3] %vm914_vm13, %v1692_v0  ;;  %933 = vst.msk [vmem:[#allocation3 + $0x98] sm:$0x3] %vm914_vm13, %v1692_v0 }
  0x34   : > { %619 = vrot.lane.b32.xlu1 %v456_v63, %s1698_s29 }
  0x35   : > { %571 = vrot.lane.b32.xlu0 %v408_v7, %s1697_s28 }
  0x38   : > { %475 = vrot.lane.b32.xlu1 %v457_v1, %s1695_s26 }
  0x39   : > { %428 = vrot.lane.b32.xlu0 %v409_v9, %s1693_s24 }
  0x3c   : > { %668 = vrot.lane.b32.xlu1 %v359_v3, %s1699_s7 }
  0x3d   : > { %621 = vrot.lane.b32.xlu0 %v457_v1, %s1698_s29 }
  0x40   : > { %524 = vrot.lane.b32.xlu1 %v360_v8, %s1696_s27 }
  0x41   : > { %477 = vrot.lane.b32.xlu0 %v458_v2, %s1695_s26 }
  0x44   : > { %717 = vrot.lane.b32.xlu1 %v408_v7, %s1700_s14 }
  0x45   : > { %670 = vrot.lane.b32.xlu0 %v360_v8, %s1699_s7 }
  0x48   : > { %526 = vrot.lane.b32.xlu1 %v507_v15, %s1696_s27 }
  0x49   : > { %381 = vrot.lane.b32.xlu0 %v507_v15, %s1694_s25 }
  0x4c   : > { %719 = vrot.lane.b32.xlu1 %v409_v9, %s1700_s14 }
  0x4d   : > { %573 = vrot.lane.b32.xlu0 %v409_v9, %s1697_s28 }
  0x50   : > { %430 = vrot.lane.b32.xlu1 %v410_v16, %s1693_s24 }
  0x51   : > { %383 = vrot.lane.b32.xlu0 %v362_v17, %s1694_s25 }
  0x54   : > { %623 = vrot.lane.b32.xlu1 %v458_v2, %s1698_s29 }
  0x55   : > { %575 = vrot.lane.b32.xlu0 %v410_v16, %s1697_s28 }
  0x58   : > { %479 = vrot.lane.b32.xlu1 %v459_v4, %s1695_s26 }
  0x59   : > { %432 = vrot.lane.b32.xlu0 %v411_v18, %s1693_s24 }
  0x5c   : > { %672 = vrot.lane.b32.xlu1 %v507_v15, %s1699_s7 }
  0x5d   : > { %625 = vrot.lane.b32.xlu0 %v459_v4, %s1698_s29 }
  0x60   : > { %528 = vrot.lane.b32.xlu1 %v362_v17, %s1696_s27 }
  0x61   : > { %481 = vrot.lane.b32.xlu0 %v1850_v5, %s1695_s26 }
  0x64   : > { %721 = vrot.lane.b32.xlu1 %v410_v16, %s1700_s14 }
  0x65   : > { %674 = vrot.lane.b32.xlu0 %v362_v17, %s1699_s7 }
  0x68   : > { %530 = vrot.lane.b32.xlu1 %v509_v19, %s1696_s27 }
  0x69   : > { %385 = vrot.lane.b32.xlu0 %v509_v19, %s1694_s25 }
  0x6c   : > { %723 = vrot.lane.b32.xlu1 %v411_v18, %s1700_s14 }
  0x6d   : > { %577 = vrot.lane.b32.xlu0 %v411_v18, %s1697_s28 }
  0x70   : > { %434 = vrot.lane.b32.xlu1 %v558_v21, %s1693_s24 }
  0x71   : > { %387 = vrot.lane.b32.xlu0 %v364_v20, %s1694_s25  ;;  %s1704_s25 = smov 40  }
  0x74   : > { %627 = vrot.lane.b32.xlu1 %v1850_v5, %s1698_s29 }
  0x75   : > { %579 = vrot.lane.b32.xlu0 %v558_v21, %s1697_s28 }
  0x78   : > { %483 = vrot.lane.b32.xlu1 %v1854_v6, %s1695_s26 }
  0x79   : > { %436 = vrot.lane.b32.xlu0 %v413_v22, %s1693_s24 }
  0x7c   : > { %676 = vrot.lane.b32.xlu1 %v509_v19, %s1699_s7 }
  0x7d   : > { %629 = vrot.lane.b32.xlu0 %v1854_v6, %s1698_s29 }
  0x80   : > { %532 = vrot.lane.b32.xlu1 %v364_v20, %s1696_s27 }
  0x81   : > { %485 = vrot.lane.b32.xlu0 %v462_v23, %s1695_s26 }
  0x84   : > { %725 = vrot.lane.b32.xlu1 %v558_v21, %s1700_s14 }
  0x85   : > { %678 = vrot.lane.b32.xlu0 %v364_v20, %s1699_s7 }
  0x87   : > { %v423_v26 = vpop.permute.xlu1 %422 }
  0x88   : > { %v374_v25 = vpop.permute.xlu0 %373  ;;  %581 = vrot.lane.b32.xlu1 %v413_v22, %s1697_s28 }
  0x89   : > { %398 = vst.msk [vmem:[#allocation4] sm:$0xff] %vm397_vm3, %v374_v25  ;;  %534 = vrot.lane.b32.xlu0 %v511_v24, %s1696_s27 }
  0x8a   : > { %447 = vst.msk [vmem:[#allocation4] sm:$0xff] %vm446_vm4, %v423_v26 }
  0x8c   : > { %583 = vrot.lane.b32.xlu1 %v560_v27, %s1697_s28 }
  0x8d   : > { %727 = vrot.lane.b32.xlu0 %v413_v22, %s1700_s14 }
  0x90   : > { %633 = vrot.lane.b32.xlu1 %v610_v28, %s1698_s29 }
  0x91   : > { %631 = vrot.lane.b32.xlu0 %v462_v23, %s1698_s29 }
  0x92   : > { %v425_v30 = vpop.permute.xlu1 %424 }
  0x93   : > { %v376_v31 = vpop.permute.xlu0 %375 }
  0x94   : > { %399 = vst.msk [vmem:[#allocation4 + $0x8] sm:$0xff] %vm397_vm3, %v376_v31  ;;  %682 = vrot.lane.b32.xlu1 %v659_v29, %s1699_s7 }
  0x95   : > { %448 = vst.msk [vmem:[#allocation4 + $0x8] sm:$0xff] %vm446_vm4, %v425_v30  ;;  %680 = vrot.lane.b32.xlu0 %v511_v24, %s1699_s7 }
  0x96   : > { %v474_v33 = vpop.permute.xlu1 %473 }
  0x97   : > { %v472_v34 = vpop.permute.xlu0 %471  ;;  %497 = vst.msk [vmem:[#allocation4 + $0x8] sm:$0xff] %vm495_vm5, %v474_v33 }
  0x98   : > { %496 = vst.msk [vmem:[#allocation4] sm:$0xff] %vm495_vm5, %v472_v34  ;;  %731 = vrot.lane.b32.xlu1 %v708_v32, %s1700_s14 }
  0x99   : > { %729 = vrot.lane.b32.xlu0 %v560_v27, %s1700_s14 }
  0x9a   : > { %v378_v35 = vpop.permute.xlu1 %377 }
  0x9b   : > { %v521_v36 = vpop.permute.xlu0 %520  ;;  %400 = vst.msk [vmem:[#allocation4 + $0x10] sm:$0xff] %vm397_vm3, %v378_v35 }
  0x9c   : > { %545 = vst.msk [vmem:[#allocation4] sm:$0xff] %vm544_vm6, %v521_v36 }
  0x9e   : > { %v570_v37 = vpop.permute.xlu1 %569 }
  0x9f   : > { %v523_v38 = vpop.permute.xlu0 %522  ;;  %594 = vst.msk [vmem:[#allocation4] sm:$0xff] %vm593_vm7, %v570_v37 }
  0xa0   : > { %546 = vst.msk [vmem:[#allocation4 + $0x8] sm:$0xff] %vm544_vm6, %v523_v38  ;;  %v1212_v38 = vld [vmem:[#allocation3 + $0x90] sm:$0xff] }
  0xa1   : > { %1235 = vrot.lane.b32.xlu1 %v1212_v38, %s1701_s17 }
  0xa2   : > { %v427_v39 = vpop.permute.xlu1 %426 }
  0xa3   : > { %v380_v40 = vpop.permute.xlu0 %379  ;;  %449 = vst.msk [vmem:[#allocation4 + $0x10] sm:$0xff] %vm446_vm4, %v427_v39  ;;  %v1261_v39 = vld [vmem:[#allocation3 + $0x91] sm:$0xff] }
  0xa4   : > { %401 = vst.msk [vmem:[#allocation4 + $0x18] sm:$0xff] %vm397_vm3, %v380_v40  ;;  %v1310_v40 = vld [vmem:[#allocation3 + $0x92] sm:$0xff] }
  0xa5   : > { %1284 = vrot.lane.b32.xlu1 %v1261_v39, %s1702_s20 }
  0xa6   : > { %v620_v41 = vpop.permute.xlu1 %619 }
  0xa7   : > { %v572_v42 = vpop.permute.xlu0 %571  ;;  %644 = vst.msk [vmem:[#allocation4] sm:$0xff] %vm643_vm8, %v620_v41  ;;  %v2053_v41 = vld [vmem:[%s2292_s2] ss:$0 sm:$0xff] }
  0xa8   : > { %595 = vst.msk [vmem:[#allocation4 + $0x8] sm:$0xff] %vm593_vm7, %v572_v42 }
  0xa9   : > { %1333 = vrot.lane.b32.xlu1 %v1310_v40, %s1703_s21 }
  0xaa   : > { %v476_v43 = vpop.permute.xlu1 %475 }
  0xab   : > { %v429_v44 = vpop.permute.xlu0 %428  ;;  %498 = vst.msk [vmem:[#allocation4 + $0x10] sm:$0xff] %vm495_vm5, %v476_v43 }
  0xac   : > { %450 = vst.msk [vmem:[#allocation4 + $0x18] sm:$0xff] %vm446_vm4, %v429_v44 }
  0xae   : > { %v669_v45 = vpop.permute.xlu1 %668 }
  0xaf   : > { %v622_v46 = vpop.permute.xlu0 %621  ;;  %693 = vst.msk [vmem:[#allocation4] sm:$0xff] %vm692_vm9, %v669_v45 }
  0xb0   : > { %645 = vst.msk [vmem:[#allocation4 + $0x8] sm:$0xff] %vm643_vm8, %v622_v46 }
  0xb2   : > { %v525_v47 = vpop.permute.xlu1 %524 }
  0xb3   : > { %v478_v48 = vpop.permute.xlu0 %477  ;;  %547 = vst.msk [vmem:[#allocation4 + $0x10] sm:$0xff] %vm544_vm6, %v525_v47 }
  0xb4   : > { %499 = vst.msk [vmem:[#allocation4 + $0x18] sm:$0xff] %vm495_vm5, %v478_v48 }
  0xb6   : > { %v718_v49 = vpop.permute.xlu1 %717 }
  0xb7   : > { %v671_v50 = vpop.permute.xlu0 %670  ;;  %742 = vst.msk [vmem:[#allocation4] sm:$0xff] %vm741_vm10, %v718_v49 }
  0xb8   : > { %694 = vst.msk [vmem:[#allocation4 + $0x8] sm:$0xff] %vm692_vm9, %v671_v50 }
  0xba   : > { %v527_v51 = vpop.permute.xlu1 %526 }
  0xbb   : > { %v382_v52 = vpop.permute.xlu0 %381  ;;  %548 = vst.msk [vmem:[#allocation4 + $0x18] sm:$0xff] %vm544_vm6, %v527_v51 }
  0xbc   : > { %402 = vst.msk [vmem:[#allocation4 + $0x20] sm:$0xff] %vm397_vm3, %v382_v52 }
  0xbe   : > { %v720_v53 = vpop.permute.xlu1 %719  ;;  %v750_v55 = vld [vmem:[#allocation4] sm:$0xff] }
  0xbf   : > { %v574_v54 = vpop.permute.xlu0 %573  ;;  %743 = vst.msk [vmem:[#allocation4 + $0x8] sm:$0xff] %vm741_vm10, %v720_v53  ;;  %1629 = vmatprep.mubr.msk.f32.mxu0 %vm770_vm11, %v750_v55 }
  0xc0   : > { %596 = vst.msk [vmem:[#allocation4 + $0x10] sm:$0xff] %vm593_vm7, %v574_v54 }
  0xc2   : > { %v431_v56 = vpop.permute.xlu1 %430 }
  0xc3   : > { %v384_v57 = vpop.permute.xlu0 %383  ;;  %451 = vst.msk [vmem:[#allocation4 + $0x20] sm:$0xff] %vm446_vm4, %v431_v56 }
  0xc4   : > { %403 = vst.msk [vmem:[#allocation4 + $0x28] sm:$0xff] %vm397_vm3, %v384_v57 }
  0xc6   : > { %v624_v58 = vpop.permute.xlu1 %623  ;;  %v751_v60 = vld [vmem:[#allocation4 + $0x8] sm:$0xff] }
  0xc7   : > { %v576_v59 = vpop.permute.xlu0 %575  ;;  %646 = vst.msk [vmem:[#allocation4 + $0x10] sm:$0xff] %vm643_vm8, %v624_v58  ;;  %1630 = vmatmul.mubr.msk.f32.vlgmr.msra.gmra.mxu0 %vm770_vm11, %v751_v60 }
  0xc8   : > { %597 = vst.msk [vmem:[#allocation4 + $0x18] sm:$0xff] %vm593_vm7, %v576_v59 }
  0xca   : > { %v480_v61 = vpop.permute.xlu1 %479 }
  0xcb   : > { %v433_v62 = vpop.permute.xlu0 %432  ;;  %500 = vst.msk [vmem:[#allocation4 + $0x20] sm:$0xff] %vm495_vm5, %v480_v61 }
  0xcc   : > { %452 = vst.msk [vmem:[#allocation4 + $0x28] sm:$0xff] %vm446_vm4, %v433_v62 }
  0xce   : > { %v673_v63 = vpop.permute.xlu1 %672 }
  0xcf   : > { %v626_v1 = vpop.permute.xlu0 %625  ;;  %695 = vst.msk [vmem:[#allocation4 + $0x10] sm:$0xff] %vm692_vm9, %v673_v63 }
  0xd0   : > { %647 = vst.msk [vmem:[#allocation4 + $0x18] sm:$0xff] %vm643_vm8, %v626_v1 }
  0xd2   : > { %v529_v2 = vpop.permute.xlu1 %528 }
  0xd3   : > { %v482_v3 = vpop.permute.xlu0 %481  ;;  %549 = vst.msk [vmem:[#allocation4 + $0x20] sm:$0xff] %vm544_vm6, %v529_v2 }
  0xd4   : > { %501 = vst.msk [vmem:[#allocation4 + $0x28] sm:$0xff] %vm495_vm5, %v482_v3 }
  0xd6   : > { %v722_v4 = vpop.permute.xlu1 %721 }
  0xd7   : > { %v675_v5 = vpop.permute.xlu0 %674  ;;  %744 = vst.msk [vmem:[#allocation4 + $0x10] sm:$0xff] %vm741_vm10, %v722_v4 }
  0xd8   : > { %696 = vst.msk [vmem:[#allocation4 + $0x18] sm:$0xff] %vm692_vm9, %v675_v5 }
  0xda   : > { %v531_v6 = vpop.permute.xlu1 %530 }
  0xdb   : > { %v386_v7 = vpop.permute.xlu0 %385  ;;  %550 = vst.msk [vmem:[#allocation4 + $0x28] sm:$0xff] %vm544_vm6, %v531_v6 }
  0xdc   : > { %404 = vst.msk [vmem:[#allocation4 + $0x30] sm:$0xff] %vm397_vm3, %v386_v7 }
  0xde   : > { %v724_v8 = vpop.permute.xlu1 %723  ;;  %v752_v10 = vld [vmem:[#allocation4 + $0x10] sm:$0xff] }
  0xdf   : > { %v578_v9 = vpop.permute.xlu0 %577  ;;  %745 = vst.msk [vmem:[#allocation4 + $0x18] sm:$0xff] %vm741_vm10, %v724_v8  ;;  %1632 = vmatprep.mubr.msk.f32.mxu0 %vm770_vm11, %v752_v10 }
  0xe0   : > { %598 = vst.msk [vmem:[#allocation4 + $0x20] sm:$0xff] %vm593_vm7, %v578_v9 }
  0xe2   : > { %v435_v12 = vpop.permute.xlu1 %434 }
  0xe3   : > { %v388_v11 = vpop.permute.xlu0 %387  ;;  %453 = vst.msk [vmem:[#allocation4 + $0x30] sm:$0xff] %vm446_vm4, %v435_v12 }
  0xe4   : > { %405 = vst.msk [vmem:[#allocation4 + $0x38] sm:$0xff] %vm397_vm3, %v388_v11  ;;  %vm1195_vm3 = vcmask 392512  }
  0xe6   : > { %v753_v14 = vld [vmem:[#allocation4 + $0x18] sm:$0xff]  ;;  %v628_v15 = vpop.permute.xlu1 %627 }
  0xe7   : > { %v580_v13 = vpop.permute.xlu0 %579  ;;  %1633 = vmatmul.mubr.msk.f32.gmra.mxu0 %vm770_vm11, %v753_v14  ;;  %648 = vst.msk [vmem:[#allocation4 + $0x20] sm:$0xff] %vm643_vm8, %v628_v15 }
  0xe8   : > { %599 = vst.msk [vmem:[#allocation4 + $0x28] sm:$0xff] %vm593_vm7, %v580_v13 }
  0xea   : > { %v484_v17 = vpop.permute.xlu1 %483 }
  0xeb   : > { %v437_v16 = vpop.permute.xlu0 %436  ;;  %502 = vst.msk [vmem:[#allocation4 + $0x30] sm:$0xff] %vm495_vm5, %v484_v17 }
  0xec   : > { %454 = vst.msk [vmem:[#allocation4 + $0x38] sm:$0xff] %vm446_vm4, %v437_v16  ;;  %vm1245_vm4 = vcmask 458112  }
  0xee   : > { %v677_v19 = vpop.permute.xlu1 %676 }
  0xef   : > { %v630_v18 = vpop.permute.xlu0 %629  ;;  %697 = vst.msk [vmem:[#allocation4 + $0x20] sm:$0xff] %vm692_vm9, %v677_v19 }
  0xf0   : > { %649 = vst.msk [vmem:[#allocation4 + $0x28] sm:$0xff] %vm643_vm8, %v630_v18 }
  0xf2   : > { %v533_v21 = vpop.permute.xlu1 %532 }
  0xf3   : > { %v486_v20 = vpop.permute.xlu0 %485  ;;  %551 = vst.msk [vmem:[#allocation4 + $0x30] sm:$0xff] %vm544_vm6, %v533_v21 }
  0xf4   : > { %503 = vst.msk [vmem:[#allocation4 + $0x38] sm:$0xff] %vm495_vm5, %v486_v20  ;;  %vm1294_vm5 = vcmask 523712  }
  0xf6   : > { %v726_v23 = vpop.permute.xlu1 %725 }
  0xf7   : > { %v679_v22 = vpop.permute.xlu0 %678  ;;  %746 = vst.msk [vmem:[#allocation4 + $0x20] sm:$0xff] %vm741_vm10, %v726_v23 }
  0xf8   : > { %698 = vst.msk [vmem:[#allocation4 + $0x28] sm:$0xff] %vm692_vm9, %v679_v22 }
  0xfa   : > { %v582_v25 = vpop.permute.xlu1 %581 }
  0xfb   : > { %v535_v24 = vpop.permute.xlu0 %534  ;;  %600 = vst.msk [vmem:[#allocation4 + $0x30] sm:$0xff] %vm593_vm7, %v582_v25 }
  0xfc   : > { %552 = vst.msk [vmem:[#allocation4 + $0x38] sm:$0xff] %vm544_vm6, %v535_v24  ;;  %vm1343_vm6 = vcmask 589312  }
  0xfe   : > { %v754_v27 = vld [vmem:[#allocation4 + $0x20] sm:$0xff]  ;;  %v584_v28 = vpop.permute.xlu1 %583 }
  0xff   : > { %v728_v26 = vpop.permute.xlu0 %727  ;;  %1635 = vmatprep.mubr.msk.f32.mxu0 %vm770_vm11, %v754_v27  ;;  %601 = vst.msk [vmem:[#allocation4 + $0x38] sm:$0xff] %vm593_vm7, %v584_v28  ;;  %v959_v27 = vld [vmem:[#allocation3 + $0x1] sm:$0xff]  ;;  %vm1367_vm7 = vcmask 588800  }
 0x100   : > { %747 = vst.msk [vmem:[#allocation4 + $0x28] sm:$0xff] %vm741_vm10, %v728_v26  ;;  %v943_v26 = vld [vmem:[#allocation3] sm:$0xff] }
 0x101   : > { %951 = vst.msk [vmem:[#allocation5] sm:$0xff] %vm912_vm12, %v943_v26 }
 0x102   : > { %v634_v30 = vpop.permute.xlu1 %633 }
 0x103   : > { %v632_v29 = vpop.permute.xlu0 %631  ;;  %651 = vst.msk [vmem:[#allocation4 + $0x38] sm:$0xff] %vm643_vm8, %v634_v30  ;;  %v1008_v30 = vld [vmem:[#allocation3 + $0x2] sm:$0xff] }
 0x104   : > { %650 = vst.msk [vmem:[#allocation4 + $0x30] sm:$0xff] %vm643_vm8, %v632_v29  ;;  %vm1466_vm8 = vcmask 523264  }
 0x106   : > { %v683_v33 = vpop.permute.xlu1 %682 }
 0x107   : > { %v755_v31 = vld [vmem:[#allocation4 + $0x28] sm:$0xff]  ;;  %v681_v32 = vpop.permute.xlu0 %680  ;;  %700 = vst.msk [vmem:[#allocation4 + $0x38] sm:$0xff] %vm692_vm9, %v683_v33 }
 0x108   : > { %1636 = vmatmul.mubr.msk.f32.gmra.mxu0 %vm770_vm11, %v755_v31  ;;  %699 = vst.msk [vmem:[#allocation4 + $0x30] sm:$0xff] %vm692_vm9, %v681_v32 }
 0x10a   : > { %v732_v35 = vpop.permute.xlu1 %731 }
 0x10b   : > { %v730_v34 = vpop.permute.xlu0 %729  ;;  %749 = vst.msk [vmem:[#allocation4 + $0x38] sm:$0xff] %vm741_vm10, %v732_v35 }
 0x10c   : > { %748 = vst.msk [vmem:[#allocation4 + $0x30] sm:$0xff] %vm741_vm10, %v730_v34 }
 0x112   : > { %v757_v37 = vld [vmem:[#allocation4 + $0x38] sm:$0xff] }
 0x113   : > { %v756_v36 = vld [vmem:[#allocation4 + $0x30] sm:$0xff]  ;;  %v2181_v35 = vpop.permute.xlu1 %1235 }
 0x114   : > { %1638 = vmatprep.mubr.msk.f32.mxu0 %vm770_vm11, %v756_v36 }
 0x115   : > { %1639 = vmatmul.mubr.msk.f32.gmra.mxu0 %vm770_vm11, %v757_v37 }
 0x117   : > { %v2184_v36 = vpop.permute.xlu1 %1284 }
 0x11b   : > { %v2191_v38 = vpop.permute.xlu1 %1333 }
 0x187   : > { %v1631_v42 = vpop.f32.mrf.mxu0 }
 0x188   : > { %v871_v43 = vadd.f32 %v1631_v42, %v2053_v41 }
 0x189   : > { %v865_v44 = vpop.f32.mrf.mxu0 }
 0x18a   : > { %v905_v45 = vmax.f32 %v871_v43, 0.0  ;;  %v866_v46 = vadd.f32 %v2053_v41, %v865_v44  ;;  %v1361_v43 = vld [vmem:[%s2294_s4] sm:$0xff]  ;;  %v1706_v44 = vmov 0  }
 0x18b   : > { %1683 = vset.pattern.permute.xlu0 %v1706_v44 }
 0x18c   : > { %936 = vst.msk [vmem:[#allocation3 + $0x21] sm:$0xff] %vm912_vm12, %v905_v45  ;;  %v904_v47 = vmax.f32 %v866_v46, 0.0 }
 0x18e   : > { %935 = vst.msk [vmem:[#allocation3 + $0x11] sm:$0xff] %vm912_vm12, %v904_v47 }
 0x193   : > { %v2059_v48 = vld [vmem:[#allocation3 + $0x21] sm:$0xff] }
 0x194   : > { %v2061_v49 = vld [vmem:[#allocation3 + $0x20] sm:$0xff]  ;;  %979 = vrot.lane.b32.xlu0 %v2059_v48, %s1693_s24 }
 0x195   : > { %953 = vst.msk [vmem:[#allocation5 + $0x10] sm:$0xff] %vm912_vm12, %v2061_v49  ;;  %v2067_v50 = vld [vmem:[#allocation3 + $0x22] sm:$0xff]  ;;  %v2069_v51 = vld [vmem:[#allocation3 + $0x10] sm:$0xff] }
 0x196   : > { %952 = vst.msk [vmem:[#allocation5 + $0x8] sm:$0xff] %vm912_vm12, %v2069_v51  ;;  %v2077_v52 = vld [vmem:[#allocation3 + $0x11] sm:$0xff] }
 0x197   : > { %v2081_v53 = vld [vmem:[#allocation3 + $0x12] sm:$0xff] }
 0x198   : > { %1028 = vrot.lane.b32.xlu0 %v2067_v50, %s1696_s27 }
 0x19c   : > { %1075 = vrot.lane.b32.xlu0 %v2061_v49, %s1698_s29 }
 0x1a0   : > { %977 = vrot.lane.b32.xlu0 %v2077_v52, %s1693_s24 }
 0x1a4   : > { %1026 = vrot.lane.b32.xlu0 %v2081_v53, %s1696_s27 }
 0x1a7   : > { %v1634_v54 = vpop.f32.mrf.mxu0 }
 0x1a8   : > { %v881_v55 = vadd.f32 %v1634_v54, %v2053_v41 }
 0x1a9   : > { %v875_v56 = vpop.f32.mrf.mxu0 }
 0x1aa   : > { %v907_v57 = vmax.f32 %v881_v55, 0.0  ;;  %v876_v58 = vadd.f32 %v2053_v41, %v875_v56 }
 0x1ac   : > { %938 = vst.msk [vmem:[#allocation3 + $0x41] sm:$0xff] %vm912_vm12, %v907_v57  ;;  %v906_v59 = vmax.f32 %v876_v58, 0.0 }
 0x1ae   : > { %937 = vst.msk [vmem:[#allocation3 + $0x31] sm:$0xff] %vm912_vm12, %v906_v59 }
 0x1b3   : > { %v2089_v60 = vld [vmem:[#allocation3 + $0x42] sm:$0xff] }
 0x1b4   : > { %v963_v61 = vld [vmem:[#allocation3 + $0x41] sm:$0xff]  ;;  %1177 = vrot.lane.b32.xlu1 %v2089_v60, %s1704_s25 }
 0x1b5   : > { %v1207_v62 = vld [vmem:[#allocation3 + $0x40] sm:$0xff]  ;;  %983 = vrot.lane.b32.xlu0 %v963_v61, %s1693_s24  ;;  %v2095_v63 = vld [vmem:[#allocation3 + $0x30] sm:$0xff] }
 0x1b6   : > { %955 = vst.msk [vmem:[#allocation5 + $0x20] sm:$0xff] %vm912_vm12, %v1207_v62  ;;  %954 = vst.msk [vmem:[#allocation5 + $0x18] sm:$0xff] %vm912_vm12, %v2095_v63  ;;  %v2104_v1 = vld [vmem:[#allocation3 + $0x32] sm:$0xff] }
 0x1b7   : > { %v2109_v2 = vld [vmem:[#allocation3 + $0x31] sm:$0xff] }
 0x1b8   : > { %1225 = vrot.lane.b32.xlu1 %v1207_v62, %s1701_s17 }
 0x1b9   : > { %1032 = vrot.lane.b32.xlu0 %v2089_v60, %s1696_s27 }
 0x1bc   : > { %1274 = vrot.lane.b32.xlu1 %v963_v61, %s1702_s20 }
 0x1bd   : > { %1079 = vrot.lane.b32.xlu0 %v1207_v62, %s1698_s29 }
 0x1c0   : > { %1175 = vrot.lane.b32.xlu1 %v2104_v1, %s1704_s25 }
 0x1c1   : > { %1128 = vrot.lane.b32.xlu0 %v963_v61, %s1700_s14 }
 0x1c5   : > { %981 = vrot.lane.b32.xlu0 %v2109_v2, %s1693_s24 }
 0x1c8   : > { %v1637_v3 = vpop.f32.mrf.mxu0 }
 0x1c9   : > { %v891_v4 = vadd.f32 %v1637_v3, %v2053_v41  ;;  %1030 = vrot.lane.b32.xlu0 %v2104_v1, %s1696_s27 }
 0x1ca   : > { %v885_v5 = vpop.f32.mrf.mxu0 }
 0x1cb   : > { %v909_v6 = vmax.f32 %v891_v4, 0.0  ;;  %v886_v7 = vadd.f32 %v2053_v41, %v885_v5 }
 0x1cd   : > { %940 = vst.msk [vmem:[#allocation3 + $0x61] sm:$0xff] %vm912_vm12, %v909_v6  ;;  %v908_v8 = vmax.f32 %v886_v7, 0.0  ;;  %1077 = vrot.lane.b32.xlu0 %v2095_v63, %s1698_s29 }
 0x1cf   : > { %939 = vst.msk [vmem:[#allocation3 + $0x51] sm:$0xff] %vm912_vm12, %v908_v8 }
 0x1d1   : > { %1126 = vrot.lane.b32.xlu0 %v2109_v2, %s1700_s14 }
 0x1d4   : > { %v1160_v9 = vld [vmem:[#allocation3 + $0x62] sm:$0xff] }
 0x1d5   : > { %v965_v10 = vld [vmem:[#allocation3 + $0x61] sm:$0xff]  ;;  %1181 = vrot.lane.b32.xlu1 %v1160_v9, %s1704_s25  ;;  %v1640_v12 = vpop.f32.mrf.mxu0 }
 0x1d6   : > { %v1209_v11 = vld [vmem:[#allocation3 + $0x60] sm:$0xff]  ;;  %987 = vrot.lane.b32.xlu0 %v965_v10, %s1693_s24  ;;  %v901_v13 = vadd.f32 %v1640_v12, %v2053_v41  ;;  %v1208_v14 = vld [vmem:[#allocation3 + $0x50] sm:$0xff] }
 0x1d7   : > { %957 = vst.msk [vmem:[#allocation5 + $0x30] sm:$0xff] %vm912_vm12, %v1209_v11  ;;  %v895_v15 = vpop.f32.mrf.mxu0  ;;  %956 = vst.msk [vmem:[#allocation5 + $0x28] sm:$0xff] %vm912_vm12, %v1208_v14  ;;  %v1159_v20 = vld [vmem:[#allocation3 + $0x52] sm:$0xff] }
 0x1d8   : > { %v911_v16 = vmax.f32 %v901_v13, 0.0  ;;  %v896_v17 = vadd.f32 %v2053_v41, %v895_v15  ;;  %v964_v21 = vld [vmem:[#allocation3 + $0x51] sm:$0xff] }
 0x1d9   : > { %1229 = vrot.lane.b32.xlu1 %v1209_v11, %s1701_s17 }
 0x1da   : > { %1036 = vrot.lane.b32.xlu0 %v1160_v9, %s1696_s27  ;;  %942 = vst.msk [vmem:[#allocation3 + $0x81] sm:$0xff] %vm912_vm12, %v911_v16  ;;  %v910_v18 = vmax.f32 %v896_v17, 0.0 }
 0x1dc   : > { %941 = vst.msk [vmem:[#allocation3 + $0x71] sm:$0xff] %vm912_vm12, %v910_v18 }
 0x1dd   : > { %1278 = vrot.lane.b32.xlu1 %v965_v10, %s1702_s20 }
 0x1de   : > { %1083 = vrot.lane.b32.xlu0 %v1209_v11, %s1698_s29 }
 0x1e1   : > { %1327 = vrot.lane.b32.xlu1 %v1160_v9, %s1703_s21  ;;  %v1113_v22 = vld [vmem:[#allocation3 + $0x81] sm:$0xff] }
 0x1e2   : > { %1132 = vrot.lane.b32.xlu0 %v965_v10, %s1700_s14  ;;  %v1064_v23 = vld [vmem:[#allocation3 + $0x80] sm:$0xff] }
 0x1e3   : > { %v1063_v19 = vld [vmem:[#allocation3 + $0x70] sm:$0xff]  ;;  %v1162_v24 = vld [vmem:[#allocation3 + $0x82] sm:$0xff] }
 0x1e4   : > { %958 = vst.msk [vmem:[#allocation5 + $0x38] sm:$0xff] %vm912_vm12, %v1063_v19  ;;  %v966_v25 = vld [vmem:[#allocation3 + $0x71] sm:$0xff] }
 0x1e5   : > { %1179 = vrot.lane.b32.xlu1 %v1159_v20, %s1704_s25  ;;  %v1015_v29 = vld [vmem:[#allocation3 + $0x72] sm:$0xff] }
 0x1e6   : > { %985 = vrot.lane.b32.xlu0 %v964_v21, %s1693_s24 }
 0x1e9   : > { %1227 = vrot.lane.b32.xlu1 %v1208_v14, %s1701_s17 }
 0x1ea   : > { %1034 = vrot.lane.b32.xlu0 %v1159_v20, %s1696_s27 }
 0x1ed   : > { %1276 = vrot.lane.b32.xlu1 %v964_v21, %s1702_s20 }
 0x1ee   : > { %1081 = vrot.lane.b32.xlu0 %v1208_v14, %s1698_s29 }
 0x1f1   : > { %1325 = vrot.lane.b32.xlu1 %v1159_v20, %s1703_s21 }
 0x1f2   : > { %1130 = vrot.lane.b32.xlu0 %v964_v21, %s1700_s14 }
 0x1f5   : > { %1136 = vrot.lane.b32.xlu1 %v1113_v22, %s1700_s14 }
 0x1f6   : > { %1087 = vrot.lane.b32.xlu0 %v1064_v23, %s1698_s29 }
 0x1f9   : > { %1185 = vrot.lane.b32.xlu1 %v1162_v24, %s1704_s25 }
 0x1fa   : > { %989 = vrot.lane.b32.xlu0 %v966_v25, %s1693_s24 }
 0x1fd   : > { %1233 = vrot.lane.b32.xlu1 %v1064_v23, %s1701_s17 }
 0x1fe   : > { %1085 = vrot.lane.b32.xlu0 %v1063_v19, %s1698_s29 }
 0x201   : > { %1282 = vrot.lane.b32.xlu1 %v1113_v22, %s1702_s20 }
 0x202   : > { %1134 = vrot.lane.b32.xlu0 %v966_v25, %s1700_s14 }
 0x205   : > { %1331 = vrot.lane.b32.xlu1 %v1162_v24, %s1703_s21 }
 0x206   : > { %1124 = vrot.lane.b32.xlu0 %v2059_v48, %s1700_s14  ;;  %v980_v28 = vpop.permute.xlu0 %979 }
 0x207   : > { %1002 = vst.msk [vmem:[#allocation5 + $0x10] sm:$0xff] %vm999_vm14, %v980_v28 }
 0x209   : > { %1038 = vrot.lane.b32.xlu1 %v1015_v29, %s1696_s27 }
 0x20a   : > { %975 = vrot.lane.b32.xlu0 %v959_v27, %s1693_s24  ;;  %v1029_v31 = vpop.permute.xlu0 %1028 }
 0x20b   : > { %1051 = vst.msk [vmem:[#allocation5 + $0x10] sm:$0xff] %vm1048_vm15, %v1029_v31 }
 0x20d   : > { %1323 = vrot.lane.b32.xlu1 %v2089_v60, %s1703_s21 }
 0x20e   : > { %1024 = vrot.lane.b32.xlu0 %v1008_v30, %s1696_s27  ;;  %v1076_v32 = vpop.permute.xlu0 %1075 }
 0x211   : > { %1173 = vrot.lane.b32.xlu1 %v2067_v50, %s1704_s25 }
 0x212   : > { %1073 = vrot.lane.b32.xlu0 %v2069_v51, %s1698_s29  ;;  %v978_v33 = vpop.permute.xlu0 %977  ;;  %s1543_s29 = sshll.u32 %s2297_s19, 3 }
 0x213   : > { %1001 = vst.msk [vmem:[#allocation5 + $0x8] sm:$0xff] %vm999_vm14, %v978_v33  ;;  %s222_s7 = scalar_lea.vmem %s2295_s5, %s1543_s29 }
 0x215   : > { %1183 = vrot.lane.b32.xlu1 %v1015_v29, %s1704_s25 }
 0x216   : > { %1122 = vrot.lane.b32.xlu0 %v2077_v52, %s1700_s14  ;;  %v1027_v34 = vpop.permute.xlu0 %1026 }
 0x217   : > { %1050 = vst.msk [vmem:[#allocation5 + $0x8] sm:$0xff] %vm1048_vm15, %v1027_v34 }
 0x218   : > { %1099 = vst.msk [vmem:[#allocation5 + $0x8] sm:$0xff] %vm1097_vm0, %v1076_v32 }
 0x219   : > { %1231 = vrot.lane.b32.xlu1 %v1063_v19, %s1701_s17 }
 0x21a   : > { %1171 = vrot.lane.b32.xlu0 %v2081_v53, %s1704_s25 }
 0x21d   : > { %1280 = vrot.lane.b32.xlu1 %v966_v25, %s1702_s20 }
 0x21e   : > { %1270 = vrot.lane.b32.xlu0 %v2059_v48, %s1702_s20 }
 0x221   : > { %1329 = vrot.lane.b32.xlu1 %v1015_v29, %s1703_s21 }
 0x222   : > { %1364 = vperm.xlu0 %1683, %v1361_v43  }
 0x225   : > { %1223 = vrot.lane.b32.xlu1 %v2095_v63, %s1701_s17 }
 0x226   : > { %v1178_v41 = vpop.permute.xlu1 %1177 }
 0x227   : > { %v984_v37 = vpop.permute.xlu0 %983 }
 0x228   : > { %1004 = vst.msk [vmem:[#allocation5 + $0x20] sm:$0xff] %vm999_vm14, %v984_v37 }
 0x229   : > { %1272 = vrot.lane.b32.xlu1 %v2109_v2, %s1702_s20 }
 0x22a   : > { %v1226_v45 = vpop.permute.xlu1 %1225 }
 0x22b   : > { %v1033_v39 = vpop.permute.xlu0 %1032 }
 0x22c   : > { %1053 = vst.msk [vmem:[#allocation5 + $0x20] sm:$0xff] %vm1048_vm15, %v1033_v39 }
 0x22d   : > { %1321 = vrot.lane.b32.xlu1 %v2104_v1, %s1703_s21 }
 0x22e   : > { %v1275_v48 = vpop.permute.xlu1 %1274 }
 0x22f   : > { %v1080_v40 = vpop.permute.xlu0 %1079 }
 0x231   : > { %1221 = vrot.lane.b32.xlu1 %v2061_v49, %s1701_s17 }
 0x233   : > { %v1129_v42 = vpop.permute.xlu0 %1128 }
 0x235   : > { %1319 = vrot.lane.b32.xlu1 %v2067_v50, %s1703_s21  ;;  %v1176_v50 = vpop.permute.xlu1 %1175 }
 0x237   : > { %v982_v46 = vpop.permute.xlu0 %981 }
 0x238   : > { %1003 = vst.msk [vmem:[#allocation5 + $0x18] sm:$0xff] %vm999_vm14, %v982_v46 }
 0x23b   : > { %v1031_v47 = vpop.permute.xlu0 %1030 }
 0x23c   : > { %1052 = vst.msk [vmem:[#allocation5 + $0x18] sm:$0xff] %vm1048_vm15, %v1031_v47 }
 0x23d   : > { %1101 = vst.msk [vmem:[#allocation5 + $0x18] sm:$0xff] %vm1097_vm0, %v1080_v40 }
 0x23e   : > { %1150 = vst.msk [vmem:[#allocation5 + $0x18] sm:$0xff] %vm1146_vm2, %v1129_v42 }
 0x23f   : > { %v1078_v49 = vpop.permute.xlu0 %1077  ;;  %1199 = vst.msk [vmem:[#allocation5 + $0x18] sm:$0xff] %vm1195_vm3, %v1178_v41  ;;  %v1352_v41 = vld [vmem:[%s2293_s3] sm:$0xff] }
 0x240   : > { %1100 = vst.msk [vmem:[#allocation5 + $0x10] sm:$0xff] %vm1097_vm0, %v1078_v49 }
 0x243   : > { %v1127_v51 = vpop.permute.xlu0 %1126 }
 0x244   : > { %1149 = vst.msk [vmem:[#allocation5 + $0x10] sm:$0xff] %vm1146_vm2, %v1127_v51 }
 0x245   : > { %1198 = vst.msk [vmem:[#allocation5 + $0x10] sm:$0xff] %vm1195_vm3, %v1176_v50 }
 0x246   : > { %1248 = vst.msk [vmem:[#allocation5 + $0x10] sm:$0xff] %vm1245_vm4, %v1226_v45 }
 0x247   : > { %v1182_v52 = vpop.permute.xlu1 %1181  ;;  %1297 = vst.msk [vmem:[#allocation5 + $0x10] sm:$0xff] %vm1294_vm5, %v1275_v48 }
 0x248   : > { %v988_v53 = vpop.permute.xlu0 %987 }
 0x249   : > { %1006 = vst.msk [vmem:[#allocation5 + $0x30] sm:$0xff] %vm999_vm14, %v988_v53 }
 0x24b   : > { %v1230_v54 = vpop.permute.xlu1 %1229 }
 0x24c   : > { %v1037_v55 = vpop.permute.xlu0 %1036 }
 0x24d   : > { %1055 = vst.msk [vmem:[#allocation5 + $0x30] sm:$0xff] %vm1048_vm15, %v1037_v55 }
 0x24f   : > { %v1279_v56 = vpop.permute.xlu1 %1278 }
 0x250   : > { %v1084_v57 = vpop.permute.xlu0 %1083 }
 0x253   : > { %v1328_v58 = vpop.permute.xlu1 %1327 }
 0x254   : > { %v1133_v59 = vpop.permute.xlu0 %1132 }
 0x257   : > { %v1180_v60 = vpop.permute.xlu1 %1179 }
 0x258   : > { %v986_v61 = vpop.permute.xlu0 %985 }
 0x259   : > { %1005 = vst.msk [vmem:[#allocation5 + $0x28] sm:$0xff] %vm999_vm14, %v986_v61 }
 0x25b   : > { %v1228_v62 = vpop.permute.xlu1 %1227 }
 0x25c   : > { %v1035_v63 = vpop.permute.xlu0 %1034  ;;  %1249 = vst.msk [vmem:[#allocation5 + $0x18] sm:$0xff] %vm1245_vm4, %v1228_v62 }
 0x25d   : > { %1054 = vst.msk [vmem:[#allocation5 + $0x28] sm:$0xff] %vm1048_vm15, %v1035_v63 }
 0x25e   : > { %1103 = vst.msk [vmem:[#allocation5 + $0x28] sm:$0xff] %vm1097_vm0, %v1084_v57 }
 0x25f   : > { %1152 = vst.msk [vmem:[#allocation5 + $0x28] sm:$0xff] %vm1146_vm2, %v1133_v59  ;;  %v1277_v1 = vpop.permute.xlu1 %1276 }
 0x260   : > { %1201 = vst.msk [vmem:[#allocation5 + $0x28] sm:$0xff] %vm1195_vm3, %v1182_v52  ;;  %v1082_v2 = vpop.permute.xlu0 %1081 }
 0x261   : > { %1298 = vst.msk [vmem:[#allocation5 + $0x18] sm:$0xff] %vm1294_vm5, %v1277_v1 }
 0x262   : > { %1102 = vst.msk [vmem:[#allocation5 + $0x20] sm:$0xff] %vm1097_vm0, %v1082_v2 }
 0x263   : > { %v1326_v3 = vpop.permute.xlu1 %1325 }
 0x264   : > { %v1131_v4 = vpop.permute.xlu0 %1130  ;;  %1347 = vst.msk [vmem:[#allocation5 + $0x18] sm:$0xff] %vm1343_vm6, %v1326_v3 }
 0x265   : > { %1151 = vst.msk [vmem:[#allocation5 + $0x20] sm:$0xff] %vm1146_vm2, %v1131_v4 }
 0x266   : > { %1200 = vst.msk [vmem:[#allocation5 + $0x20] sm:$0xff] %vm1195_vm3, %v1180_v60 }
 0x267   : > { %1250 = vst.msk [vmem:[#allocation5 + $0x20] sm:$0xff] %vm1245_vm4, %v1230_v54  ;;  %v1137_v5 = vpop.permute.xlu1 %1136 }
 0x268   : > { %1299 = vst.msk [vmem:[#allocation5 + $0x20] sm:$0xff] %vm1294_vm5, %v1279_v56  ;;  %v1088_v6 = vpop.permute.xlu0 %1087 }
 0x269   : > { %1348 = vst.msk [vmem:[#allocation5 + $0x20] sm:$0xff] %vm1343_vm6, %v1328_v58 }
 0x26b   : > { %v1186_v7 = vpop.permute.xlu1 %1185 }
 0x26c   : > { %v990_v8 = vpop.permute.xlu0 %989 }
 0x26d   : > { %1007 = vst.msk [vmem:[#allocation5 + $0x38] sm:$0xff] %vm999_vm14, %v990_v8 }
 0x26f   : > { %v1234_v9 = vpop.permute.xlu1 %1233 }
 0x270   : > { %v1086_v10 = vpop.permute.xlu0 %1085  ;;  %v1357_v33 = vld [vmem:[#allocation5 + $0x20] sm:$0xff] }
 0x271   : > { %1104 = vst.msk [vmem:[#allocation5 + $0x30] sm:$0xff] %vm1097_vm0, %v1086_v10 }
 0x273   : > { %v1283_v11 = vpop.permute.xlu1 %1282 }
 0x274   : > { %v1135_v12 = vpop.permute.xlu0 %1134 }
 0x275   : > { %1153 = vst.msk [vmem:[#allocation5 + $0x30] sm:$0xff] %vm1146_vm2, %v1135_v12 }
 0x277   : > { %v1332_v13 = vpop.permute.xlu1 %1331 }
 0x278   : > { %v1125_v14 = vpop.permute.xlu0 %1124 }
 0x279   : > { %1148 = vst.msk [vmem:[#allocation5 + $0x8] sm:$0xff] %vm1146_vm2, %v1125_v14 }
 0x27b   : > { %v1039_v15 = vpop.permute.xlu1 %1038 }
 0x27c   : > { %v976_v16 = vpop.permute.xlu0 %975  ;;  %1056 = vst.msk [vmem:[#allocation5 + $0x38] sm:$0xff] %vm1048_vm15, %v1039_v15 }
 0x27d   : > { %1000 = vst.msk [vmem:[#allocation5] sm:$0xff] %vm999_vm14, %v976_v16 }
 0x27e   : > { %1105 = vst.msk [vmem:[#allocation5 + $0x38] sm:$0xff] %vm1097_vm0, %v1088_v6 }
 0x27f   : > { %1154 = vst.msk [vmem:[#allocation5 + $0x38] sm:$0xff] %vm1146_vm2, %v1137_v5  ;;  %v1324_v17 = vpop.permute.xlu1 %1323 }
 0x280   : > { %1203 = vst.msk [vmem:[#allocation5 + $0x38] sm:$0xff] %vm1195_vm3, %v1186_v7  ;;  %v1025_v18 = vpop.permute.xlu0 %1024 }
 0x281   : > { %1253 = vst.msk [vmem:[#allocation5 + $0x38] sm:$0xff] %vm1245_vm4, %v2181_v35  ;;  %v1356_v35 = vld [vmem:[#allocation5 + $0x18] sm:$0xff] }
 0x282   : > { %1346 = vst.msk [vmem:[#allocation5 + $0x10] sm:$0xff] %vm1343_vm6, %v1324_v17 }
 0x283   : > { %1049 = vst.msk [vmem:[#allocation5] sm:$0xff] %vm1048_vm15, %v1025_v18  ;;  %v1174_v19 = vpop.permute.xlu1 %1173 }
 0x284   : > { %1302 = vst.msk [vmem:[#allocation5 + $0x38] sm:$0xff] %vm1294_vm5, %v2184_v36  ;;  %v1074_v20 = vpop.permute.xlu0 %1073 }
 0x285   : > { %1351 = vst.msk [vmem:[#allocation5 + $0x38] sm:$0xff] %vm1343_vm6, %v2191_v38 }
 0x286   : > { %1197 = vst.msk [vmem:[#allocation5 + $0x8] sm:$0xff] %vm1195_vm3, %v1174_v19 }
 0x287   : > { %1098 = vst.msk [vmem:[#allocation5] sm:$0xff] %vm1097_vm0, %v1074_v20  ;;  %v1184_v21 = vpop.permute.xlu1 %1183 }
 0x288   : > { %v1123_v22 = vpop.permute.xlu0 %1122  ;;  %1202 = vst.msk [vmem:[#allocation5 + $0x30] sm:$0xff] %vm1195_vm3, %v1184_v21 }
 0x289   : > { %1147 = vst.msk [vmem:[#allocation5] sm:$0xff] %vm1146_vm2, %v1123_v22  ;;  %v1355_v38 = vld [vmem:[#allocation5 + $0x10] sm:$0xff] }
 0x28a   : > { %1252 = vst.msk [vmem:[#allocation5 + $0x30] sm:$0xff] %vm1245_vm4, %v1234_v9 }
 0x28b   : > { %1301 = vst.msk [vmem:[#allocation5 + $0x30] sm:$0xff] %vm1294_vm5, %v1283_v11  ;;  %v1232_v24 = vpop.permute.xlu1 %1231 }
 0x28c   : > { %v1360_v23 = vld [vmem:[#allocation5 + $0x38] sm:$0xff]  ;;  %1350 = vst.msk [vmem:[#allocation5 + $0x30] sm:$0xff] %vm1343_vm6, %v1332_v13  ;;  %v1172_v25 = vpop.permute.xlu0 %1171 }
 0x28d   : > { %1642 = vmatpush3.xpose.msk.msra.mxu1 %vm1367_vm7, %v1360_v23  ;;  %1251 = vst.msk [vmem:[#allocation5 + $0x28] sm:$0xff] %vm1245_vm4, %v1232_v24 }
 0x28e   : > { %1643 = vmatprep.subr.mxu1 %v1692_v0  ;;  %1196 = vst.msk [vmem:[#allocation5] sm:$0xff] %vm1195_vm3, %v1172_v25 }
 0x28f   : > { %v1281_v26 = vpop.permute.xlu1 %1280 }
 0x290   : > { %1300 = vst.msk [vmem:[#allocation5 + $0x28] sm:$0xff] %vm1294_vm5, %v1281_v26  ;;  %v1271_v36 = vpop.permute.xlu0 %1270 }
 0x293   : > { %v1359_v27 = vld [vmem:[#allocation5 + $0x30] sm:$0xff]  ;;  %v1330_v28 = vpop.permute.xlu1 %1329 }
 0x294   : > { %1644 = vmatpush3.xpose.msk.msra.mxu1 %vm1367_vm7, %v1359_v27  ;;  %1349 = vst.msk [vmem:[#allocation5 + $0x28] sm:$0xff] %vm1343_vm6, %v1330_v28 }
 0x295   : > { %1645 = vmatprep.subr.mxu1 %v1692_v0 }
 0x297   : > { %v1224_v29 = vpop.permute.xlu1 %1223 }
 0x298   : > { %1247 = vst.msk [vmem:[#allocation5 + $0x8] sm:$0xff] %vm1245_vm4, %v1224_v29 }
 0x29b   : > { %v1273_v30 = vpop.permute.xlu1 %1272  ;;  %v1358_v31 = vld [vmem:[#allocation5 + $0x28] sm:$0xff] }
 0x29c   : > { %1296 = vst.msk [vmem:[#allocation5 + $0x8] sm:$0xff] %vm1294_vm5, %v1273_v30  ;;  %1646 = vmatpush3.xpose.msk.msra.mxu1 %vm1367_vm7, %v1358_v31 }
 0x29d   : > { %1647 = vmatprep.subr.mxu1 %v1692_v0  ;;  %v1365_v42 = vpop.permute.xlu0 %1364 }
 0x29f   : > { %v1322_v32 = vpop.permute.xlu1 %1321 }
 0x2a0   : > { %1345 = vst.msk [vmem:[#allocation5 + $0x8] sm:$0xff] %vm1343_vm6, %v1322_v32  ;;  %1648 = vmatpush3.xpose.msk.msra.mxu1 %vm1367_vm7, %v1357_v33 }
 0x2a1   : > { %1649 = vmatprep.subr.mxu1 %v1692_v0 }
 0x2a3   : > { %v1222_v34 = vpop.permute.xlu1 %1221 }
 0x2a4   : > { %1246 = vst.msk [vmem:[#allocation5] sm:$0xff] %vm1245_vm4, %v1222_v34  ;;  %1650 = vmatpush3.xpose.msk.msra.mxu1 %vm1367_vm7, %v1356_v35 }
 0x2a5   : > { %1295 = vst.msk [vmem:[#allocation5] sm:$0xff] %vm1294_vm5, %v1271_v36  ;;  %1651 = vmatprep.subr.mxu1 %v1692_v0 }
 0x2a7   : > { %v1320_v37 = vpop.permute.xlu1 %1319  ;;  %v1354_v39 = vld [vmem:[#allocation5 + $0x8] sm:$0xff] }
 0x2a8   : > { %1344 = vst.msk [vmem:[#allocation5] sm:$0xff] %vm1343_vm6, %v1320_v37  ;;  %1652 = vmatpush3.xpose.msk.msra.mxu1 %vm1367_vm7, %v1355_v38 }
 0x2a9   : > { %1653 = vmatprep.subr.mxu1 %v1692_v0 }
 0x2ac   : > { %1654 = vmatpush3.xpose.msk.msra.mxu1 %vm1367_vm7, %v1354_v39 }
 0x2ad   : > { %1655 = vmatprep.subr.mxu1 %v1692_v0 }
 0x2af   : > { %v1353_v40 = vld [vmem:[#allocation5] sm:$0xff] }
 0x2b0   : > { %1656 = vmatpush3.xpose.msk.msra.mxu1 %vm1367_vm7, %v1353_v40 }
 0x2b3   : > { %1658 = vmatmul.mubr.msk.f32.vlgmr.msra.gmra.mxu1 %vm1367_vm7, %v1352_v41 }
 0x373   : > { %v1461_v43 = vpop.f32.mrf.mxu1 }
 0x374   : > { %v1462_v44 = vadd.f32 %v1461_v43, %v1365_v42 }
 0x375   : > { %v1659_v45 = vpop.f32.mrf.mxu1 }
 0x376   : > { %v1465_v0 = vmax.f32 %v1462_v44, 0.0 }
 0x378   : > { %1467 = vst.msk [vmem:[%s222_s7] sm:$0xff] %vm1466_vm8, %v1465_v0 }
 0x379 PF: > { %s15_s18 = sadd.s32 1, %s1690_s18  }
 0x37a   : > { %p12_p4 = scmp.ge.s32.totalorder %s15_s18, 4  }
 0x37c   :  { %14 = sbr.rel (!%p12_p4) target bundleno = 1 (0x1), region = 105 }

</bundles_post_ra>
